<compile_context>
chip_gen: v6e
topology: v6e:2x2x1
jax: 0.10.0
libtpu: 0.0.40
codegen_flags: <defaults>
</compile_context>

<pallas_src>
import math
import functools

import jax
import jax.numpy as jnp
from jax.experimental import pallas as pl
from jax.experimental.pallas import tpu as pltpu

NGF = 64
BN_EPS = 1e-5

# VMEM budget: safe on every generation (v5e default scoped is 16 MiB -> raise;
# v6e/v7x default is 32 MiB).  Tile targets below keep double-buffered bf16
# A/B tiles + the f32 accumulator + f32 output tile well under ~8 MiB.
VMEM_LIMIT_BYTES = 32 * 1024 * 1024
_TM_TARGET = 512     # rows per tile (mem-bound sweet spot 512-1024)
_TN_TARGET = 512     # output columns per tile (multiple of 128, >=256 for MXU)
_TK_TARGET = 1024    # contraction tile (multiple of 128)


def _pick_tile(dim, target, quantum):
    """Largest divisor of `dim` that is a multiple of `quantum` and <= target.

    Falls back to the full dimension (a full-extent block is always legal)."""
    if dim <= target:
        return dim
    t = (target // quantum) * quantum
    while t >= quantum:
        if dim % t == 0:
            return t
        t -= quantum
    return dim


# --------------------------- Pallas kernels ---------------------------------

def _matmul_stats_kernel(a_ref, b_ref, o_ref, stats_ref, acc_ref, *, activation):
    """Tiled matmul with f32 accumulator, optional fused tanh, and fused
    per-column sum / sum-of-squares (BatchNorm statistics) in the epilogue."""
    k = pl.program_id(2)

    @pl.when(k == 0)
    def _init():
        acc_ref[...] = jnp.zeros_like(acc_ref)

    acc_ref[...] += jnp.dot(a_ref[...], b_ref[...],
                            preferred_element_type=jnp.float32)

    @pl.when(k == pl.num_programs(2) - 1)
    def _finalize():
        y = acc_ref[...]
        if activation == "tanh":
            y = jnp.tanh(y)
        o_ref[...] = y.astype(o_ref.dtype)
        s = jnp.sum(y, axis=0, keepdims=True)          # (1, tn)
        sq = jnp.sum(y * y, axis=0, keepdims=True)     # (1, tn)
        stats_ref[...] = jnp.concatenate([s, sq], axis=0)[None]   # (1, 2, tn)


def matmul_stats(a, b, activation="none"):
    """out = act(a @ b) with bf16 MXU inputs and f32 accumulation.

    Returns (out (M, N) f32, stats (gm, 2, N) f32) where summing stats over the
    leading axis gives per-column sum (row 0) and sum-of-squares (row 1)."""
    M, K = a.shape
    K2, Nc = b.shape
    assert K == K2
    tm = _pick_tile(M, _TM_TARGET, 8)
    tn = _pick_tile(Nc, _TN_TARGET, 128)
    tk = _pick_tile(K, _TK_TARGET, 128)
    gm, gn, gk = M // tm, Nc // tn, K // tk

    a16 = a.astype(jnp.bfloat16)
    b16 = b.astype(jnp.bfloat16)

    kern = functools.partial(_matmul_stats_kernel, activation=activation)
    out, stats = pl.pallas_call(
        kern,
        out_shape=(
            jax.ShapeDtypeStruct((M, Nc), jnp.float32),
            jax.ShapeDtypeStruct((gm, 2, Nc), jnp.float32),
        ),
        grid_spec=pltpu.PrefetchScalarGridSpec(
            num_scalar_prefetch=0,
            grid=(gm, gn, gk),
            in_specs=[
                pl.BlockSpec((tm, tk), lambda i, j, k: (i, k)),
                pl.BlockSpec((tk, tn), lambda i, j, k: (k, j)),
            ],
            out_specs=(
                pl.BlockSpec((tm, tn), lambda i, j, k: (i, j)),
                pl.BlockSpec((1, 2, tn), lambda i, j, k: (i, 0, j)),
            ),
            scratch_shapes=[pltpu.VMEM((tm, tn), jnp.float32)],
        ),
        compiler_params=pltpu.CompilerParams(
            dimension_semantics=("parallel", "parallel", "arbitrary"),
            vmem_limit_bytes=VMEM_LIMIT_BYTES,
        ),
    )(a16, b16)
    return out, stats


def _scale_bias_relu_kernel(y_ref, s_ref, b_ref, o_ref):
    o_ref[...] = jnp.maximum(y_ref[...] * s_ref[...] + b_ref[...], 0.0
                             ).astype(o_ref.dtype)


def scale_bias_relu(y, scale_cols, bias_cols):
    """Row/column tiled: out = relu(y * scale + bias), per-column scale/bias."""
    M, Nc = y.shape
    tm = _pick_tile(M, _TM_TARGET, 8)
    tn = _pick_tile(Nc, _TN_TARGET, 128)
    return pl.pallas_call(
        _scale_bias_relu_kernel,
        out_shape=jax.ShapeDtypeStruct((M, Nc), jnp.float32),
        grid_spec=pltpu.PrefetchScalarGridSpec(
            num_scalar_prefetch=0,
            grid=(M // tm, Nc // tn),
            in_specs=[
                pl.BlockSpec((tm, tn), lambda i, j: (i, j)),
                pl.BlockSpec((1, tn), lambda i, j: (0, j)),
                pl.BlockSpec((1, tn), lambda i, j: (0, j)),
            ],
            out_specs=pl.BlockSpec((tm, tn), lambda i, j: (i, j)),
        ),
        compiler_params=pltpu.CompilerParams(
            dimension_semantics=("parallel", "parallel"),
            vmem_limit_bytes=VMEM_LIMIT_BYTES,
        ),
    )(y, scale_cols, bias_cols)


# ------------------- conv-transpose lowering (layout glue) ------------------

def _extract_patches_3x3(x_nhwc):
    """(N, H, W, Cin) -> (N*H*W, 9*Cin): 3x3 windows of the 1-padded input."""
    N, H, W, Cin = x_nhwc.shape
    xp = jnp.pad(x_nhwc, ((0, 0), (1, 1), (1, 1), (0, 0)))
    taps = [xp[:, r:r + H, s:s + W, :] for r in range(3) for s in range(3)]
    a = jnp.stack(taps, axis=3)                       # (N, H, W, 9, Cin)
    return a.reshape(N * H * W, 9 * Cin)


def _pack_stride2_weights(w):
    """PyTorch ConvTranspose2d weight (Cin, Cout, 4, 4) -> (9*Cin, 4*Cout).

    Sub-pixel decomposition of k=4, s=2, p=1: output pixel (2m+ph, 2l+pw)
    only sees kernel taps kh in {3,1} (ph=0) / {2,0} (ph=1) applied to the
    3x3 window of the 1-padded input around (m, l).  Column block
    p = 2*ph + pw stacks the 4 phases along the lane dimension."""
    Cin, Cout = w.shape[0], w.shape[1]
    # window row r -> kernel tap kh used by phase ph (missing => zero)
    tap = {0: {0: 3, 1: 1}, 1: {1: 2, 2: 0}}
    wb = jnp.zeros((3, 3, Cin, 4 * Cout), jnp.float32)
    for ph in (0, 1):
        for pw in (0, 1):
            p = 2 * ph + pw
            for r, kh in tap[ph].items():
                for s, kw in tap[pw].items():
                    wb = wb.at[r, s, :, p * Cout:(p + 1) * Cout].set(w[:, :, kh, kw])
    return wb.reshape(9 * Cin, 4 * Cout)


def _pack_first_weights(w):
    """(z, C0, 4, 4) -> (z, 16*C0), columns ordered (kh, kw, c)."""
    z, C0 = w.shape[0], w.shape[1]
    return jnp.transpose(w, (0, 2, 3, 1)).reshape(z, 16 * C0)


def _phase_to_space(y, N, H, W, Cout):
    """(N*H*W, 4*Cout) phase-major output -> (N, 2H, 2W, Cout) NHWC."""
    t = y.reshape(N, H, W, 2, 2, Cout)                # (..., ph, pw, c)
    t = jnp.transpose(t, (0, 1, 3, 2, 4, 5))          # (N, H, ph, W, pw, c)
    return t.reshape(N, 2 * H, 2 * W, Cout)


def _bn_scale_bias(stats, gamma, beta, n_groups, rows):
    """Fold fused matmul statistics into per-column scale/bias (f32).

    Columns are grouped (g, c) with c fastest; BN is over all rows & groups."""
    C = gamma.shape[0]
    col = stats.sum(axis=0)                            # (2, G*C)
    ch = col.reshape(2, n_groups, C).sum(axis=1)       # (2, C)
    count = rows * n_groups
    mean = ch[0] / count
    var = ch[1] / count - mean * mean                  # biased batch variance
    inv = jax.lax.rsqrt(var + BN_EPS)
    scale = gamma * inv
    bias = beta - mean * scale
    return jnp.tile(scale, n_groups)[None, :], jnp.tile(bias, n_groups)[None, :]


# ----------------------------- Generator model ------------------------------

def init_generator_params(key, image_size, image_channels, z_size):
    """Deterministic init mimicking Generator.init_weights:
    conv weights ~ N(0, 0.02), BN gamma ~ N(1, 0.02), BN beta = 0."""
    out_channels = int(NGF * image_size / 8)
    mid_layer_count = int(math.log(image_size / 16, 2) + 1)
    keys = iter(jax.random.split(key, 2 * (mid_layer_count + 2)))

    w0 = 0.02 * jax.random.normal(next(keys), (z_size, out_channels, 4, 4), jnp.float32)
    g0 = 1.0 + 0.02 * jax.random.normal(next(keys), (out_channels,), jnp.float32)
    b0 = jnp.zeros((out_channels,), jnp.float32)

    mid = []
    in_c = out_channels
    for _ in range(mid_layer_count):
        out_c = int(in_c / 2)
        w = 0.02 * jax.random.normal(next(keys), (in_c, out_c, 4, 4), jnp.float32)
        g = 1.0 + 0.02 * jax.random.normal(next(keys), (out_c,), jnp.float32)
        b = jnp.zeros((out_c,), jnp.float32)
        mid.append((w, g, b))
        in_c = out_c

    wf = 0.02 * jax.random.normal(next(keys), (in_c, image_channels, 4, 4), jnp.float32)
    return {"first": (w0, g0, b0), "mid": mid, "final": wf}


def pack_generator_params(params):
    """Pre-pack weights into the matmul layouts (done once, outside jit)."""
    w0, g0, b0 = params["first"]
    mid = [(_pack_stride2_weights(w), g, b) for (w, g, b) in params["mid"]]
    wf = _pack_stride2_weights(params["final"])        # (9*Cin, 4*image_channels)
    n_real = wf.shape[1]
    n_pad = max(128, -(-n_real // 128) * 128)          # lane-dense output columns
    wf = jnp.pad(wf, ((0, 0), (0, n_pad - n_real)))
    return {"first": (_pack_first_weights(w0), g0, b0), "mid": mid, "final": wf}


@functools.partial(jax.jit, static_argnames=("image_channels",))
def generator_forward(z_nchw, packed, *, image_channels):
    """z_nchw: (N, z_size, 1, 1) -> (N, image_channels, image_size, image_size)."""
    N = z_nchw.shape[0]
    x = z_nchw.reshape(N, -1)                          # (N, z)

    # First layer: ConvTranspose2d(z, C0, 4, 1, 0) on 1x1 input + BN + ReLU.
    w0, g0, b0 = packed["first"]
    C0 = g0.shape[0]
    y, stats = matmul_stats(x, w0)                     # (N, 16*C0), cols (kh,kw,c)
    sc, bi = _bn_scale_bias(stats, g0, b0, 16, N)
    y = scale_bias_relu(y, sc, bi)
    h = y.reshape(N, 4, 4, C0)                         # NHWC

    # Mid layers: ConvTranspose2d(k=4, s=2, p=1) + BN + ReLU (phase-fused matmul).
    for (wm, g, b) in packed["mid"]:
        Nb, H, W, _ = h.shape
        Cout = g.shape[0]
        a = _extract_patches_3x3(h)                    # (N*H*W, 9*Cin)
        y, stats = matmul_stats(a, wm)                 # (N*H*W, 4*Cout)
        sc, bi = _bn_scale_bias(stats, g, b, 4, Nb * H * W)
        y = scale_bias_relu(y, sc, bi)
        h = _phase_to_space(y, Nb, H, W, Cout)

    # Final layer: ConvTranspose2d(k=4, s=2, p=1) + fused tanh, padded columns.
    wf = packed["final"]
    Nb, H, W, _ = h.shape
    a = _extract_patches_3x3(h)
    y, _ = matmul_stats(a, wf, activation="tanh")      # (N*H*W, padded)
    y = y[:, :4 * image_channels]
    out = _phase_to_space(y, Nb, H, W, image_channels)  # NHWC
    # Final NHWC->NCHW layout op stays in XLA (cheap, inside the same jit).
    return jnp.transpose(out, (0, 3, 1, 2))


# ----------------------------------- main ------------------------------------

if __name__ == "__main__":
    image_size, image_channels, z_size, batch = 16, 3, 32, 2

    key = jax.random.PRNGKey(0)
    pkey, zkey = jax.random.split(key)
    params = init_generator_params(pkey, image_size, image_channels, z_size)
    packed = pack_generator_params(params)
    z = jax.random.normal(zkey, (batch, z_size, 1, 1), jnp.float32)

    out = generator_forward(z, packed, image_channels=image_channels)
    out = jax.block_until_ready(out)

    assert out.shape == (batch, image_channels, image_size, image_size), out.shape
    assert bool(jnp.all(jnp.isfinite(out)))
    assert bool(jnp.all(jnp.abs(out) <= 1.0 + 1e-6))   # tanh output range
    print("KERNEL_OK")
</pallas_src>

<mosaic_0001>
module attributes {stable_mosaic.version = 11 : i64} {
  func.func @_matmul_stats_kernel(%arg0: i32, %arg1: i32, %arg2: i32, %arg3: memref<2x32xbf16, #tpu.memory_space<vmem>>, %arg4: memref<32x512xbf16, #tpu.memory_space<vmem>>, %arg5: memref<2x512xf32, #tpu.memory_space<vmem>>, %arg6: memref<1x2x512xf32, #tpu.memory_space<vmem>>, %arg7: memref<2x512xf32, #tpu.memory_space<vmem>>) attributes {dimension_semantics = [#tpu.dimension_semantics<parallel>, #tpu.dimension_semantics<parallel>, #tpu.dimension_semantics<arbitrary>], iteration_bounds = array<i64: 1, 4, 1>, scalar_prefetch = 0 : i64, scratch_operands = 1 : i64, tpu.core_type = #tpu.core_type<tc>, window_params = [{transform_indices = @transform_0, window_bounds = array<i64: 2, 32>}, {transform_indices = @transform_1, window_bounds = array<i64: 32, 512>}, {transform_indices = @transform_2, window_bounds = array<i64: 2, 512>}, {transform_indices = @transform_3, window_bounds = array<i64: 1, 2, 512>}]} {
    %c0_i32 = arith.constant 0 : i32
    %0 = arith.cmpi eq, %arg2, %c0_i32 : i32
    %1 = arith.extui %0 : i1 to i32
    %c0_i32_0 = arith.constant 0 : i32
    %2 = arith.cmpi ne, %1, %c0_i32_0 : i32
    scf.if %2 {
      %cst_10 = arith.constant 0.000000e+00 : f32
      %12 = vector.broadcast %cst_10 : f32 to vector<2x512xf32>
      %c0_11 = arith.constant 0 : index
      %c0_12 = arith.constant 0 : index
      %13 = vector.load %arg7[%c0_11, %c0_12] : memref<2x512xf32, #tpu.memory_space<vmem>>, vector<2x512xf32>
      tpu.vector_store %arg7[%c0_11, %c0_12], %12 {strides = array<i32>} : memref<2x512xf32, #tpu.memory_space<vmem>>, vector<2x512xf32>,
    } else {
    }
    %c0 = arith.constant 0 : index
    %c0_1 = arith.constant 0 : index
    %3 = vector.load %arg7[%c0, %c0_1] : memref<2x512xf32, #tpu.memory_space<vmem>>, vector<2x512xf32>
    %c0_2 = arith.constant 0 : index
    %c0_3 = arith.constant 0 : index
    %4 = vector.load %arg3[%c0_2, %c0_3] : memref<2x32xbf16, #tpu.memory_space<vmem>>, vector<2x32xbf16>
    %c0_4 = arith.constant 0 : index
    %c0_5 = arith.constant 0 : index
    %5 = vector.load %arg4[%c0_4, %c0_5] : memref<32x512xbf16, #tpu.memory_space<vmem>>, vector<32x512xbf16>
    %cst = arith.constant dense<0.000000e+00> : vector<2x512xf32>
    %6 = tpu.matmul %4, %5, %cst {dimension_numbers = #tpu.dot_dimension_numbers<[1], [0], [0], [1], [0, 0, 1, 1], [], []>} : vector<2x32xbf16>, vector<32x512xbf16>, vector<2x512xf32> -> vector<2x512xf32>
    %7 = arith.addf %3, %6 : vector<2x512xf32>
    %c0_6 = arith.constant 0 : index
    %c0_7 = arith.constant 0 : index
    %8 = vector.load %arg7[%c0_6, %c0_7] : memref<2x512xf32, #tpu.memory_space<vmem>>, vector<2x512xf32>
    tpu.vector_store %arg7[%c0_6, %c0_7], %7 {strides = array<i32>} : memref<2x512xf32, #tpu.memory_space<vmem>>, vector<2x512xf32>,
    %c0_i32_8 = arith.constant 0 : i32
    %9 = arith.cmpi eq, %arg2, %c0_i32_8 : i32
    %10 = arith.extui %9 : i1 to i32
    %c0_i32_9 = arith.constant 0 : i32
    %11 = arith.cmpi ne, %10, %c0_i32_9 : i32
    scf.if %11 {
      %c0_10 = arith.constant 0 : index
      %c0_11 = arith.constant 0 : index
      %12 = vector.load %arg7[%c0_10, %c0_11] : memref<2x512xf32, #tpu.memory_space<vmem>>, vector<2x512xf32>
      %c0_12 = arith.constant 0 : index
      %c0_13 = arith.constant 0 : index
      %13 = vector.load %arg5[%c0_12, %c0_13] : memref<2x512xf32, #tpu.memory_space<vmem>>, vector<2x512xf32>
      tpu.vector_store %arg5[%c0_12, %c0_13], %12 {strides = array<i32>} : memref<2x512xf32, #tpu.memory_space<vmem>>, vector<2x512xf32>,
      %cst_14 = arith.constant dense<0.000000e+00> : vector<512xf32>
      %14 = vector.multi_reduction <add>, %12, %cst_14 [0] : vector<2x512xf32> to vector<512xf32>
      %15 = vector.shape_cast %14 : vector<512xf32> to vector<1x512xf32>
      %16 = arith.mulf %12, %12 : vector<2x512xf32>
      %cst_15 = arith.constant dense<0.000000e+00> : vector<512xf32>
      %17 = vector.multi_reduction <add>, %16, %cst_15 [0] : vector<2x512xf32> to vector<512xf32>
      %18 = vector.shape_cast %17 : vector<512xf32> to vector<1x512xf32>
      %19 = tpu.concatenate %15, %18 in 0 : vector<1x512xf32>, vector<1x512xf32> -> vector<2x512xf32>
      %20 = vector.shape_cast %19 : vector<2x512xf32> to vector<1x2x512xf32>
      %c0_16 = arith.constant 0 : index
      %c0_17 = arith.constant 0 : index
      %c0_18 = arith.constant 0 : index
      %21 = vector.load %arg6[%c0_16, %c0_17, %c0_18] : memref<1x2x512xf32, #tpu.memory_space<vmem>>, vector<1x2x512xf32>
      tpu.vector_store %arg6[%c0_16, %c0_17, %c0_18], %20 {strides = array<i32>} : memref<1x2x512xf32, #tpu.memory_space<vmem>>, vector<1x2x512xf32>,
    } else {
    }
    return
  }
  func.func @transform_0(%arg0: i32, %arg1: i32, %arg2: i32) -> (i32, i32) {
    %c0_i32 = arith.constant 0 : i32
    return %arg0, %arg2 : i32, i32
  }
  func.func @transform_1(%arg0: i32, %arg1: i32, %arg2: i32) -> (i32, i32) {
    %c0_i32 = arith.constant 0 : i32
    return %arg2, %arg1 : i32, i32
  }
  func.func @transform_2(%arg0: i32, %arg1: i32, %arg2: i32) -> (i32, i32) {
    %c0_i32 = arith.constant 0 : i32
    return %arg0, %arg1 : i32, i32
  }
  func.func @transform_3(%arg0: i32, %arg1: i32, %arg2: i32) -> (i32, i32, i32) {
    %c0_i32 = arith.constant 0 : i32
    %c0_i32_0 = arith.constant 0 : i32
    return %arg0, %c0_i32, %arg1 : i32, i32, i32
  }
}

module attributes {stable_mosaic.version = 11 : i64} {
  func.func @_scale_bias_relu_kernel(%arg0: i32, %arg1: i32, %arg2: memref<2x512xf32, #tpu.memory_space<vmem>>, %arg3: memref<1x512xf32, #tpu.memory_space<vmem>>, %arg4: memref<1x512xf32, #tpu.memory_space<vmem>>, %arg5: memref<2x512xf32, #tpu.memory_space<vmem>>) attributes {dimension_semantics = [#tpu.dimension_semantics<parallel>, #tpu.dimension_semantics<parallel>], iteration_bounds = array<i64: 1, 4>, scalar_prefetch = 0 : i64, scratch_operands = 0 : i64, tpu.core_type = #tpu.core_type<tc>, window_params = [{transform_indices = @transform_0, window_bounds = array<i64: 2, 512>}, {transform_indices = @transform_1, window_bounds = array<i64: 1, 512>}, {transform_indices = @transform_2, window_bounds = array<i64: 1, 512>}, {transform_indices = @transform_3, window_bounds = array<i64: 2, 512>}]} {
    %c0 = arith.constant 0 : index
    %c0_0 = arith.constant 0 : index
    %0 = vector.load %arg2[%c0, %c0_0] : memref<2x512xf32, #tpu.memory_space<vmem>>, vector<2x512xf32>
    %c0_1 = arith.constant 0 : index
    %c0_2 = arith.constant 0 : index
    %1 = vector.load %arg3[%c0_1, %c0_2] : memref<1x512xf32, #tpu.memory_space<vmem>>, vector<1x512xf32>
    %2 = vector.broadcast %1 : vector<1x512xf32> to vector<2x512xf32>
    %3 = arith.mulf %0, %2 : vector<2x512xf32>
    %c0_3 = arith.constant 0 : index
    %c0_4 = arith.constant 0 : index
    %4 = vector.load %arg4[%c0_3, %c0_4] : memref<1x512xf32, #tpu.memory_space<vmem>>, vector<1x512xf32>
    %5 = vector.broadcast %4 : vector<1x512xf32> to vector<2x512xf32>
    %6 = arith.addf %3, %5 : vector<2x512xf32>
    %cst = arith.constant 0.000000e+00 : f32
    %7 = vector.broadcast %cst : f32 to vector<2x512xf32>
    %8 = arith.maximumf %6, %7 : vector<2x512xf32>
    %c0_5 = arith.constant 0 : index
    %c0_6 = arith.constant 0 : index
    %9 = vector.load %arg5[%c0_5, %c0_6] : memref<2x512xf32, #tpu.memory_space<vmem>>, vector<2x512xf32>
    tpu.vector_store %arg5[%c0_5, %c0_6], %8 {strides = array<i32>} : memref<2x512xf32, #tpu.memory_space<vmem>>, vector<2x512xf32>,
    return
  }
  func.func @transform_0(%arg0: i32, %arg1: i32) -> (i32, i32) {
    %c0_i32 = arith.constant 0 : i32
    return %arg0, %arg1 : i32, i32
  }
  func.func @transform_1(%arg0: i32, %arg1: i32) -> (i32, i32) {
    %c0_i32 = arith.constant 0 : i32
    %c0_i32_0 = arith.constant 0 : i32
    return %c0_i32, %arg1 : i32, i32
  }
  func.func @transform_2(%arg0: i32, %arg1: i32) -> (i32, i32) {
    %c0_i32 = arith.constant 0 : i32
    %c0_i32_0 = arith.constant 0 : i32
    return %c0_i32, %arg1 : i32, i32
  }
  func.func @transform_3(%arg0: i32, %arg1: i32) -> (i32, i32) {
    %c0_i32 = arith.constant 0 : i32
    return %arg0, %arg1 : i32, i32
  }
}

module attributes {stable_mosaic.version = 11 : i64} {
  func.func @_matmul_stats_kernel(%arg0: i32, %arg1: i32, %arg2: i32, %arg3: memref<32x384xbf16, #tpu.memory_space<vmem>>, %arg4: memref<384x256xbf16, #tpu.memory_space<vmem>>, %arg5: memref<32x256xf32, #tpu.memory_space<vmem>>, %arg6: memref<1x2x256xf32, #tpu.memory_space<vmem>>, %arg7: memref<32x256xf32, #tpu.memory_space<vmem>>) attributes {dimension_semantics = [#tpu.dimension_semantics<parallel>, #tpu.dimension_semantics<parallel>, #tpu.dimension_semantics<arbitrary>], iteration_bounds = array<i64: 1, 1, 3>, scalar_prefetch = 0 : i64, scratch_operands = 1 : i64, tpu.core_type = #tpu.core_type<tc>, window_params = [{transform_indices = @transform_0, window_bounds = array<i64: 32, 384>}, {transform_indices = @transform_1, window_bounds = array<i64: 384, 256>}, {transform_indices = @transform_2, window_bounds = array<i64: 32, 256>}, {transform_indices = @transform_3, window_bounds = array<i64: 1, 2, 256>}]} {
    %c0_i32 = arith.constant 0 : i32
    %0 = arith.cmpi eq, %arg2, %c0_i32 : i32
    %1 = arith.extui %0 : i1 to i32
    %c0_i32_0 = arith.constant 0 : i32
    %2 = arith.cmpi ne, %1, %c0_i32_0 : i32
    scf.if %2 {
      %cst_9 = arith.constant 0.000000e+00 : f32
      %12 = vector.broadcast %cst_9 : f32 to vector<32x256xf32>
      %c0_10 = arith.constant 0 : index
      %c0_11 = arith.constant 0 : index
      %13 = vector.load %arg7[%c0_10, %c0_11] : memref<32x256xf32, #tpu.memory_space<vmem>>, vector<32x256xf32>
      tpu.vector_store %arg7[%c0_10, %c0_11], %12 {strides = array<i32>} : memref<32x256xf32, #tpu.memory_space<vmem>>, vector<32x256xf32>,
    } else {
    }
    %c0 = arith.constant 0 : index
    %c0_1 = arith.constant 0 : index
    %3 = vector.load %arg7[%c0, %c0_1] : memref<32x256xf32, #tpu.memory_space<vmem>>, vector<32x256xf32>
    %c0_2 = arith.constant 0 : index
    %c0_3 = arith.constant 0 : index
    %4 = vector.load %arg3[%c0_2, %c0_3] : memref<32x384xbf16, #tpu.memory_space<vmem>>, vector<32x384xbf16>
    %c0_4 = arith.constant 0 : index
    %c0_5 = arith.constant 0 : index
    %5 = vector.load %arg4[%c0_4, %c0_5] : memref<384x256xbf16, #tpu.memory_space<vmem>>, vector<384x256xbf16>
    %cst = arith.constant dense<0.000000e+00> : vector<32x256xf32>
    %6 = tpu.matmul %4, %5, %cst {dimension_numbers = #tpu.dot_dimension_numbers<[1], [0], [0], [1], [0, 0, 1, 1], [], []>} : vector<32x384xbf16>, vector<384x256xbf16>, vector<32x256xf32> -> vector<32x256xf32>
    %7 = arith.addf %3, %6 : vector<32x256xf32>
    %c0_6 = arith.constant 0 : index
    %c0_7 = arith.constant 0 : index
    %8 = vector.load %arg7[%c0_6, %c0_7] : memref<32x256xf32, #tpu.memory_space<vmem>>, vector<32x256xf32>
    tpu.vector_store %arg7[%c0_6, %c0_7], %7 {strides = array<i32>} : memref<32x256xf32, #tpu.memory_space<vmem>>, vector<32x256xf32>,
    %c2_i32 = arith.constant 2 : i32
    %9 = arith.cmpi eq, %arg2, %c2_i32 : i32
    %10 = arith.extui %9 : i1 to i32
    %c0_i32_8 = arith.constant 0 : i32
    %11 = arith.cmpi ne, %10, %c0_i32_8 : i32
    scf.if %11 {
      %c0_9 = arith.constant 0 : index
      %c0_10 = arith.constant 0 : index
      %12 = vector.load %arg7[%c0_9, %c0_10] : memref<32x256xf32, #tpu.memory_space<vmem>>, vector<32x256xf32>
      %c0_11 = arith.constant 0 : index
      %c0_12 = arith.constant 0 : index
      %13 = vector.load %arg5[%c0_11, %c0_12] : memref<32x256xf32, #tpu.memory_space<vmem>>, vector<32x256xf32>
      tpu.vector_store %arg5[%c0_11, %c0_12], %12 {strides = array<i32>} : memref<32x256xf32, #tpu.memory_space<vmem>>, vector<32x256xf32>,
      %cst_13 = arith.constant dense<0.000000e+00> : vector<256xf32>
      %14 = vector.multi_reduction <add>, %12, %cst_13 [0] : vector<32x256xf32> to vector<256xf32>
      %15 = vector.shape_cast %14 : vector<256xf32> to vector<1x256xf32>
      %16 = arith.mulf %12, %12 : vector<32x256xf32>
      %cst_14 = arith.constant dense<0.000000e+00> : vector<256xf32>
      %17 = vector.multi_reduction <add>, %16, %cst_14 [0] : vector<32x256xf32> to vector<256xf32>
      %18 = vector.shape_cast %17 : vector<256xf32> to vector<1x256xf32>
      %19 = tpu.concatenate %15, %18 in 0 : vector<1x256xf32>, vector<1x256xf32> -> vector<2x256xf32>
      %20 = vector.shape_cast %19 : vector<2x256xf32> to vector<1x2x256xf32>
      %c0_15 = arith.constant 0 : index
      %c0_16 = arith.constant 0 : index
      %c0_17 = arith.constant 0 : index
      %21 = vector.load %arg6[%c0_15, %c0_16, %c0_17] : memref<1x2x256xf32, #tpu.memory_space<vmem>>, vector<1x2x256xf32>
      tpu.vector_store %arg6[%c0_15, %c0_16, %c0_17], %20 {strides = array<i32>} : memref<1x2x256xf32, #tpu.memory_space<vmem>>, vector<1x2x256xf32>,
    } else {
    }
    return
  }
  func.func @transform_0(%arg0: i32, %arg1: i32, %arg2: i32) -> (i32, i32) {
    %c0_i32 = arith.constant 0 : i32
    return %arg0, %arg2 : i32, i32
  }
  func.func @transform_1(%arg0: i32, %arg1: i32, %arg2: i32) -> (i32, i32) {
    %c0_i32 = arith.constant 0 : i32
    return %arg2, %arg1 : i32, i32
  }
  func.func @transform_2(%arg0: i32, %arg1: i32, %arg2: i32) -> (i32, i32) {
    %c0_i32 = arith.constant 0 : i32
    return %arg0, %arg1 : i32, i32
  }
  func.func @transform_3(%arg0: i32, %arg1: i32, %arg2: i32) -> (i32, i32, i32) {
    %c0_i32 = arith.constant 0 : i32
    %c0_i32_0 = arith.constant 0 : i32
    return %arg0, %c0_i32, %arg1 : i32, i32, i32
  }
}

module attributes {stable_mosaic.version = 11 : i64} {
  func.func @_scale_bias_relu_kernel(%arg0: i32, %arg1: i32, %arg2: memref<32x256xf32, #tpu.memory_space<vmem>>, %arg3: memref<1x256xf32, #tpu.memory_space<vmem>>, %arg4: memref<1x256xf32, #tpu.memory_space<vmem>>, %arg5: memref<32x256xf32, #tpu.memory_space<vmem>>) attributes {dimension_semantics = [#tpu.dimension_semantics<parallel>, #tpu.dimension_semantics<parallel>], iteration_bounds = array<i64: 1, 1>, scalar_prefetch = 0 : i64, scratch_operands = 0 : i64, tpu.core_type = #tpu.core_type<tc>, window_params = [{transform_indices = @transform_0, window_bounds = array<i64: 32, 256>}, {transform_indices = @transform_1, window_bounds = array<i64: 1, 256>}, {transform_indices = @transform_2, window_bounds = array<i64: 1, 256>}, {transform_indices = @transform_3, window_bounds = array<i64: 32, 256>}]} {
    %c0 = arith.constant 0 : index
    %c0_0 = arith.constant 0 : index
    %0 = vector.load %arg2[%c0, %c0_0] : memref<32x256xf32, #tpu.memory_space<vmem>>, vector<32x256xf32>
    %c0_1 = arith.constant 0 : index
    %c0_2 = arith.constant 0 : index
    %1 = vector.load %arg3[%c0_1, %c0_2] : memref<1x256xf32, #tpu.memory_space<vmem>>, vector<1x256xf32>
    %2 = vector.broadcast %1 : vector<1x256xf32> to vector<32x256xf32>
    %3 = arith.mulf %0, %2 : vector<32x256xf32>
    %c0_3 = arith.constant 0 : index
    %c0_4 = arith.constant 0 : index
    %4 = vector.load %arg4[%c0_3, %c0_4] : memref<1x256xf32, #tpu.memory_space<vmem>>, vector<1x256xf32>
    %5 = vector.broadcast %4 : vector<1x256xf32> to vector<32x256xf32>
    %6 = arith.addf %3, %5 : vector<32x256xf32>
    %cst = arith.constant 0.000000e+00 : f32
    %7 = vector.broadcast %cst : f32 to vector<32x256xf32>
    %8 = arith.maximumf %6, %7 : vector<32x256xf32>
    %c0_5 = arith.constant 0 : index
    %c0_6 = arith.constant 0 : index
    %9 = vector.load %arg5[%c0_5, %c0_6] : memref<32x256xf32, #tpu.memory_space<vmem>>, vector<32x256xf32>
    tpu.vector_store %arg5[%c0_5, %c0_6], %8 {strides = array<i32>} : memref<32x256xf32, #tpu.memory_space<vmem>>, vector<32x256xf32>,
    return
  }
  func.func @transform_0(%arg0: i32, %arg1: i32) -> (i32, i32) {
    %c0_i32 = arith.constant 0 : i32
    return %arg0, %arg1 : i32, i32
  }
  func.func @transform_1(%arg0: i32, %arg1: i32) -> (i32, i32) {
    %c0_i32 = arith.constant 0 : i32
    %c0_i32_0 = arith.constant 0 : i32
    return %c0_i32, %arg1 : i32, i32
  }
  func.func @transform_2(%arg0: i32, %arg1: i32) -> (i32, i32) {
    %c0_i32 = arith.constant 0 : i32
    %c0_i32_0 = arith.constant 0 : i32
    return %c0_i32, %arg1 : i32, i32
  }
  func.func @transform_3(%arg0: i32, %arg1: i32) -> (i32, i32) {
    %c0_i32 = arith.constant 0 : i32
    return %arg0, %arg1 : i32, i32
  }
}

module attributes {stable_mosaic.version = 11 : i64} {
  func.func @_matmul_stats_kernel(%arg0: i32, %arg1: i32, %arg2: i32, %arg3: memref<128x576xbf16, #tpu.memory_space<vmem>>, %arg4: memref<576x128xbf16, #tpu.memory_space<vmem>>, %arg5: memref<128x128xf32, #tpu.memory_space<vmem>>, %arg6: memref<1x2x128xf32, #tpu.memory_space<vmem>>, %arg7: memref<128x128xf32, #tpu.memory_space<vmem>>) attributes {dimension_semantics = [#tpu.dimension_semantics<parallel>, #tpu.dimension_semantics<parallel>, #tpu.dimension_semantics<arbitrary>], iteration_bounds = array<i64: 1, 1, 1>, scalar_prefetch = 0 : i64, scratch_operands = 1 : i64, tpu.core_type = #tpu.core_type<tc>, window_params = [{transform_indices = @transform_0, window_bounds = array<i64: 128, 576>}, {transform_indices = @transform_1, window_bounds = array<i64: 576, 128>}, {transform_indices = @transform_2, window_bounds = array<i64: 128, 128>}, {transform_indices = @transform_3, window_bounds = array<i64: 1, 2, 128>}]} {
    %c0_i32 = arith.constant 0 : i32
    %0 = arith.cmpi eq, %arg2, %c0_i32 : i32
    %1 = arith.extui %0 : i1 to i32
    %c0_i32_0 = arith.constant 0 : i32
    %2 = arith.cmpi ne, %1, %c0_i32_0 : i32
    scf.if %2 {
      %cst_10 = arith.constant 0.000000e+00 : f32
      %12 = vector.broadcast %cst_10 : f32 to vector<128x128xf32>
      %c0_11 = arith.constant 0 : index
      %c0_12 = arith.constant 0 : index
      %13 = vector.load %arg7[%c0_11, %c0_12] : memref<128x128xf32, #tpu.memory_space<vmem>>, vector<128x128xf32>
      tpu.vector_store %arg7[%c0_11, %c0_12], %12 {strides = array<i32>} : memref<128x128xf32, #tpu.memory_space<vmem>>, vector<128x128xf32>,
    } else {
    }
    %c0 = arith.constant 0 : index
    %c0_1 = arith.constant 0 : index
    %3 = vector.load %arg7[%c0, %c0_1] : memref<128x128xf32, #tpu.memory_space<vmem>>, vector<128x128xf32>
    %c0_2 = arith.constant 0 : index
    %c0_3 = arith.constant 0 : index
    %4 = vector.load %arg3[%c0_2, %c0_3] : memref<128x576xbf16, #tpu.memory_space<vmem>>, vector<128x576xbf16>
    %c0_4 = arith.constant 0 : index
    %c0_5 = arith.constant 0 : index
    %5 = vector.load %arg4[%c0_4, %c0_5] : memref<576x128xbf16, #tpu.memory_space<vmem>>, vector<576x128xbf16>
    %cst = arith.constant dense<0.000000e+00> : vector<128x128xf32>
    %6 = tpu.matmul %4, %5, %cst {dimension_numbers = #tpu.dot_dimension_numbers<[1], [0], [0], [1], [0, 0, 1, 1], [], []>} : vector<128x576xbf16>, vector<576x128xbf16>, vector<128x128xf32> -> vector<128x128xf32>
    %7 = arith.addf %3, %6 : vector<128x128xf32>
    %c0_6 = arith.constant 0 : index
    %c0_7 = arith.constant 0 : index
    %8 = vector.load %arg7[%c0_6, %c0_7] : memref<128x128xf32, #tpu.memory_space<vmem>>, vector<128x128xf32>
    tpu.vector_store %arg7[%c0_6, %c0_7], %7 {strides = array<i32>} : memref<128x128xf32, #tpu.memory_space<vmem>>, vector<128x128xf32>,
    %c0_i32_8 = arith.constant 0 : i32
    %9 = arith.cmpi eq, %arg2, %c0_i32_8 : i32
    %10 = arith.extui %9 : i1 to i32
    %c0_i32_9 = arith.constant 0 : i32
    %11 = arith.cmpi ne, %10, %c0_i32_9 : i32
    scf.if %11 {
      %c0_10 = arith.constant 0 : index
      %c0_11 = arith.constant 0 : index
      %12 = vector.load %arg7[%c0_10, %c0_11] : memref<128x128xf32, #tpu.memory_space<vmem>>, vector<128x128xf32>
      %13 = math.tanh %12 : vector<128x128xf32>
      %c0_12 = arith.constant 0 : index
      %c0_13 = arith.constant 0 : index
      %14 = vector.load %arg5[%c0_12, %c0_13] : memref<128x128xf32, #tpu.memory_space<vmem>>, vector<128x128xf32>
      tpu.vector_store %arg5[%c0_12, %c0_13], %13 {strides = array<i32>} : memref<128x128xf32, #tpu.memory_space<vmem>>, vector<128x128xf32>,
      %cst_14 = arith.constant dense<0.000000e+00> : vector<128xf32>
      %15 = vector.multi_reduction <add>, %13, %cst_14 [0] : vector<128x128xf32> to vector<128xf32>
      %16 = vector.shape_cast %15 : vector<128xf32> to vector<1x128xf32>
      %17 = arith.mulf %13, %13 : vector<128x128xf32>
      %cst_15 = arith.constant dense<0.000000e+00> : vector<128xf32>
      %18 = vector.multi_reduction <add>, %17, %cst_15 [0] : vector<128x128xf32> to vector<128xf32>
      %19 = vector.shape_cast %18 : vector<128xf32> to vector<1x128xf32>
      %20 = tpu.concatenate %16, %19 in 0 : vector<1x128xf32>, vector<1x128xf32> -> vector<2x128xf32>
      %21 = vector.shape_cast %20 : vector<2x128xf32> to vector<1x2x128xf32>
      %c0_16 = arith.constant 0 : index
      %c0_17 = arith.constant 0 : index
      %c0_18 = arith.constant 0 : index
      %22 = vector.load %arg6[%c0_16, %c0_17, %c0_18] : memref<1x2x128xf32, #tpu.memory_space<vmem>>, vector<1x2x128xf32>
      tpu.vector_store %arg6[%c0_16, %c0_17, %c0_18], %21 {strides = array<i32>} : memref<1x2x128xf32, #tpu.memory_space<vmem>>, vector<1x2x128xf32>,
    } else {
    }
    return
  }
  func.func @transform_0(%arg0: i32, %arg1: i32, %arg2: i32) -> (i32, i32) {
    %c0_i32 = arith.constant 0 : i32
    return %arg0, %arg2 : i32, i32
  }
  func.func @transform_1(%arg0: i32, %arg1: i32, %arg2: i32) -> (i32, i32) {
    %c0_i32 = arith.constant 0 : i32
    return %arg2, %arg1 : i32, i32
  }
  func.func @transform_2(%arg0: i32, %arg1: i32, %arg2: i32) -> (i32, i32) {
    %c0_i32 = arith.constant 0 : i32
    return %arg0, %arg1 : i32, i32
  }
  func.func @transform_3(%arg0: i32, %arg1: i32, %arg2: i32) -> (i32, i32, i32) {
    %c0_i32 = arith.constant 0 : i32
    %c0_i32_0 = arith.constant 0 : i32
    return %arg0, %c0_i32, %arg1 : i32, i32, i32
  }
}

</mosaic_0001>

<bundles_post_ra>
// kernel: tile.23
= control target key start
LH: loop header
LB: loop body
LE: loop exit
PB: predicated region body
PF: predicated region fallthrough
CT: control target
= control target key end

     0   :  { %s28_s0 = inlined_call_operand.vmem [shape: f32[128], index: 0, kind: input, shape index: {}]   ;;  %s29_s1 = inlined_call_operand.vmem [shape: f32[16,128], index: 1, kind: output, shape index: {}]  }
   0x1   :  { %v4_v0 = vld [vmem:[%s28_s0] ss:$0 sm:$0xff] }
   0x2   :  { %5 = vst [vmem:[%s29_s1] sm:$0xff] %v4_v0  ;;  %8 = vst [vmem:[%s29_s1 + $0x8] sm:$0xff] %v4_v0 }

// kernel: generator_forward.6
= control target key start
LH: loop header
LB: loop body
LE: loop exit
PB: predicated region body
PF: predicated region fallthrough
CT: control target
= control target key end

     0   :  { %s513_s12 = smov 0   ;;  %s515_s13 = smov 0   ;;  %s557_s0 = inlined_call_operand.vmem [shape: f32[2,2048], index: 0, kind: input, shape index: {}]   ;;  %s558_s1 = inlined_call_operand.vmem [shape: f32[1,2048], index: 1, kind: input, shape index: {}]   ;;  %s559_s2 = inlined_call_operand.vmem [shape: f32[1,2048], index: 2, kind: input, shape index: {}]   ;;  %s560_s3 = inlined_call_operand.vmem [shape: f32[2,2048], index: 3, kind: output, shape index: {}]  }
   0x1   :  { %s517_s14 = smov 0  }
   0x2 LB: > { %s22_s15 = sadd.s32 1, %s486_s13  ;;  %p434_p0 = scmp.ge.s32.totalorder %s490_s14, 1  ;;  %s490_s14 = sphi %s517_s14, %s13_s14   ;;  %s486_s13 = sphi %s515_s13, %s562_s13   ;;  %s482_s12 = sphi %s513_s12, %s561_s12  }
   0x3   : > { %p23_p1 = scmp.ge.s32.totalorder %s22_s15, 4  ;;  %p178_p2 = scmp.lt.s32.totalorder %s490_s14, 5 }
   0x5   : > { %s564_s15 = smov (%p23_p1, %s22_s15), 0  ;;  %p179_p3 = pnand %p434_p0, %p178_p2 }
   0x6   : > { %s435_s16 = sshll.u32 (!%p179_p3), %s482_s12, 2 }
   0x7   : > { %182 = sbr.rel (%p179_p3) target bundleno = 33 (0x21), region = 32  ;;  %p221_p4 = scmp.lt.s32.totalorder (!%p179_p3), %s435_s16, 15 }
   0xc   : > { %v251_v0 = vlaneseq  ;;  %v492_v1 = vmov 1983009808   ;;  %s566_s16 = smov (!%p221_p4, %s435_s16), 15 }
   0xd   : > { %v270_v2 = vunpack.c.l.s4 %v492_v1  ;;  %s231_s19 = scalar_lea.vmem %s558_s1, %s566_s16  ;;  %s436_s20 = sshll.u32 %s566_s16, 1 }
   0xe   : > { %v252_v3 = vshrl.u32 %v251_v0, 7  ;;  %s236_s23 = scalar_lea.vmem %s559_s2, %s566_s16  ;;  %v249_v9 = vld [vmem:[%s231_s19] sm:$0xf]  ;;  %s226_s26 = scalar_lea.vmem %s557_s0, %s436_s20 }
   0xf   : > { %v271_v4 = vunpack.c.0.s8 %v270_v2  ;;  %v286_v15 = vld [vmem:[%s236_s23] sm:$0xf]  ;;  %s246_s29 = scalar_lea.vmem %s560_s3, %s436_s20 }
  0x10   : > { %v253_v5 = vsub.s32 0, %v252_v3  ;;  %v257_v6 = vsub.s32 1, %v252_v3  ;;  %v261_v7 = vsub.s32 2, %v252_v3  ;;  %v265_v8 = vsub.s32 3, %v252_v3  ;;  %v248_v26 = vld [vmem:[%s226_s26] sm:$0xff] }
  0x11   : > { %v274_v10 = vsub.s32 %v271_v4, %v252_v3 }
  0x12   : > { %v254_v11 = vrot.slane %v249_v9, %v253_v5  ;;  %v258_v12 = vrot.slane %v249_v9, %v257_v6  ;;  %v262_v13 = vrot.slane %v249_v9, %v261_v7  ;;  %v266_v14 = vrot.slane %v249_v9, %v265_v8 }
  0x13   : > { %v291_v16 = vrot.slane %v286_v15, %v253_v5  ;;  %v295_v17 = vrot.slane %v286_v15, %v257_v6  ;;  %v299_v18 = vrot.slane %v286_v15, %v261_v7  ;;  %v303_v19 = vrot.slane %v286_v15, %v265_v8 }
  0x14   : > { %v267_v20 = vcombine.low %v254_v11, %v258_v12  ;;  %v268_v21 = vcombine.low %v262_v13, %v266_v14 }
  0x15   : > { %v304_v22 = vcombine.low %v291_v16, %v295_v17  ;;  %v305_v23 = vcombine.low %v299_v18, %v303_v19 }
  0x16   : > { %v275_v24 = vrot.slane %v267_v20, %v274_v10  ;;  %v282_v25 = vrot.slane %v268_v21, %v274_v10 }
  0x17   : > { %v312_v27 = vrot.slane %v304_v22, %v274_v10  ;;  %v319_v28 = vrot.slane %v305_v23, %v274_v10 }
  0x18   : > { %v283_v29 = vcombine.low %v275_v24, %v282_v25 }
  0x19   : > { %v320_v30 = vcombine.low %v312_v27, %v319_v28 }
  0x1a   : > { %v285_v31 = vmul.f32 %v283_v29, %v248_v26 }
  0x1c   : > { %v322_v32 = vadd.f32 %v320_v30, %v285_v31 }
  0x1e   : > { %v323_v33 = vmax.f32 %v322_v32, 0.0 }
  0x20   : > { %324 = vst [vmem:[%s246_s29] sm:$0xff] %v323_v33 }
  0x21 PF: > { %s13_s14 = sadd.s32 1, %s490_s14   ;;  %s561_s12 = smov %s486_s13 }
  0x22   : > { %p10_p5 = scmp.ge.s32.totalorder %s13_s14, 6   ;;  %s562_s13 = smov %s564_s15 }
  0x24   :  { %12 = sbr.rel (!%p10_p5) target bundleno = 2 (0x2), region = 68 }

// kernel: generator_forward.5
= control target key start
LH: loop header
LB: loop body
LE: loop exit
PB: predicated region body
PF: predicated region fallthrough
CT: control target
= control target key end

     0   :  { %s894_s12 = smov 0   ;;  %s896_s13 = smov 0   ;;  %s990_s0 = inlined_call_operand.vmem [shape: bf16[2,32], index: 0, kind: input, shape index: {}]   ;;  %s991_s1 = inlined_call_operand.vmem [shape: bf16[32,2048], index: 1, kind: input, shape index: {}]   ;;  %s992_s2 = inlined_call_operand.vmem [shape: f32[2,2048], index: 2, kind: output, shape index: {0}]   ;;  %s993_s3 = inlined_call_operand.vmem [shape: f32[1,2,2048], index: 3, kind: output, shape index: {1}]  }
   0x1   :  { %s898_s14 = smov 0   ;;  %s900_s15 = smov 0  }
   0x2   :  { %s902_s16 = smov 0  }
   0x3 LB: > { %s29_s17 = sadd.s32 1, %s866_s15  ;;  %p77_p1 = scmp.ne.s32.totalorder %s858_s13, %s854_s12  ;;  %s870_s16 = sphi %s902_s16, %s14_s16   ;;  %s866_s15 = sphi %s900_s15, %s997_s15   ;;  %s862_s14 = sphi %s898_s14, %s996_s14   ;;  %s858_s13 = sphi %s896_s13, %s995_s13   ;;  %s854_s12 = sphi %s894_s12, %s994_s12  }
   0x4   : > { %p31_p0 = scmp.ge.s32.totalorder %s29_s17, 4  ;;  %p78_p2 = scmp.eq.s32.totalorder %s870_s16, 0 }
   0x5   : > { %s70_s19 = sadd.s32 1, %s858_s13  ;;  %p754_p5 = scmp.ge.s32.totalorder %s870_s16, 4 }
   0x6   : > { %s999_s17 = smov (%p31_p0, %s29_s17), 0  ;;  %p79_p3 = por %p78_p2, %p77_p1 }
   0x7   : > { %s66_s18 = ssub.s32 %s866_s15, %s999_s17  ;;  %168 = sbr.rel (%p754_p5) target bundleno = 20 (0x14), region = 20 }
   0x8   : > { %p68_p4 = scmp.eq.s32.totalorder %s66_s18, 0 }
   0xa   : > { %s929_s20 = scalar_select %p68_p4, %s858_s13, %s70_s19  }
   0xc   : > { %171 = sbr.rel (!%p79_p3) target bundleno = 20 (0x14), region = 24  ;;  %s173_s21 = sand.u32 (%p79_p3), 1, %s858_s13  }
   0xd   : > { %s776_s22 = sshll.u32 (%p79_p3), %s866_s15, 4  ;;  %s755_s23 = sshll.u32 (%p79_p3), %s173_s21, 6 }
   0xe   : > { %s181_s26 = scalar_lea.vmem (%p79_p3), %s991_s1, %s776_s22  ;;  %s175_s27 = scalar_lea.vmem (%p79_p3), [#allocation3], %s755_s23 }
   0xf   : > { %v194_v0 = vld [vmem:[%s181_s26] sm:$0xff] (%p79_p3)  ;;  %v196_v1 = vld [vmem:[%s181_s26 + $0x8] sm:$0xff] (%p79_p3) }
  0x10   : > { %v198_v2 = vld [vmem:[%s181_s26 + $0x40] sm:$0xff] (%p79_p3)  ;;  %195 = vst [vmem:[%s175_s27] sm:$0xff] (%p79_p3), %v194_v0  ;;  %197 = vst [vmem:[%s175_s27 + $0x8] sm:$0xff] (%p79_p3), %v196_v1  ;;  %v200_v3 = vld [vmem:[%s181_s26 + $0x48] sm:$0xff] (%p79_p3) }
  0x11   : > { %199 = vst [vmem:[%s175_s27 + $0x10] sm:$0xff] %v198_v2  ;;  %v202_v4 = vld [vmem:[%s181_s26 + $0x80] sm:$0xff]  ;;  %v204_v5 = vld [vmem:[%s181_s26 + $0x88] sm:$0xff]  ;;  %201 = vst [vmem:[%s175_s27 + $0x18] sm:$0xff] %v200_v3 }
  0x12   : > { %203 = vst [vmem:[%s175_s27 + $0x20] sm:$0xff] %v202_v4  ;;  %205 = vst [vmem:[%s175_s27 + $0x28] sm:$0xff] %v204_v5  ;;  %v206_v6 = vld [vmem:[%s181_s26 + $0xc0] sm:$0xff]  ;;  %v208_v7 = vld [vmem:[%s181_s26 + $0xc8] sm:$0xff] }
  0x13   : > { %207 = vst [vmem:[%s175_s27 + $0x30] sm:$0xff] %v206_v6  ;;  %209 = vst [vmem:[%s175_s27 + $0x38] sm:$0xff] %v208_v7 }
  0x14 PF: > { %p758_p6 = scmp.ge.s32.totalorder %s870_s16, 1  ;;  %p214_p7 = scmp.lt.s32.totalorder %s870_s16, 5 }
  0x16   : > { %p215_p8 = pnand %p758_p6, %p214_p7 }
  0x17   : > { %s221_s28 = sand.u32 (!%p215_p8), 1, %s854_s12   ;;  %s760_s6 = sshll.u32 (!%p215_p8), %s862_s14, 2 }
  0x18   : > { %218 = sbr.rel (%p215_p8) target bundleno = 271 (0x10f), region = 47  ;;  %s759_s29 = sshll.u32 (!%p215_p8), %s221_s28, 6 }
  0x19   : > { %s223_s30 = scalar_lea.vmem (!%p215_p8), [#allocation3], %s759_s29  ;;  %p274_p9 = scmp.lt.s32.totalorder (!%p215_p8), %s760_s6, 15 }
  0x1d   : > { %v872_v8 = vmov 0   ;;  %v820_v9 = vld [vmem:[%s223_s30 + $0x24] ss:$16 sps:$4 sm:$0xff]   ;;  %v822_v10 = vld [vmem:[%s223_s30 + $0x2c] ss:$16 sps:$4 sm:$0xff]   ;;  %vm347_vm0 = vcmask 261120   ;;  %v442_v20 = vlaneseq }
  0x1e   : > { %383 = vmatprep.mubr.bf16.mxu0 %v872_v8  ;;  %424 = vmatprep.mubr.bf16.mxu1 %v872_v8  ;;  %v824_v11 = vld [vmem:[%s223_s30 + $0x20] ss:$16 sps:$4 sm:$0xff]   ;;  %v825_v12 = vld [vmem:[%s223_s30 + $0x28] ss:$16 sps:$4 sm:$0xff]   ;;  %v826_v13 = vld [vmem:[%s223_s30 + $0x4] ss:$16 sps:$4 sm:$0xff]  }
  0x1f   : > { %363 = vmatprep.subr.bf16.mxu0 %v820_v9  ;;  %404 = vmatprep.subr.bf16.mxu1 %v822_v10  ;;  %v828_v14 = vld [vmem:[%s223_s30 + $0xc] ss:$16 sps:$4 sm:$0xff]   ;;  %v830_v15 = vld [vmem:[%s223_s30] ss:$16 sps:$4 sm:$0xff]   ;;  %v831_v16 = vld [vmem:[%s223_s30 + $0x8] ss:$16 sps:$4 sm:$0xff]  }
  0x20   : > { %364 = vmatpush1.bf16.msra.mxu0 %v824_v11  ;;  %405 = vmatpush1.bf16.msra.mxu1 %v825_v12  ;;  %v298_v17 = vld [vmem:[%s990_s0] sm:$0x1]  ;;  %v873_v18 = vmov 1983009808   ;;  %v443_v22 = vshrl.u32 %v442_v20, 7  ;;  %s1001_s6 = smov (!%p274_p9, %s760_s6), 15 }
  0x21   : > { %365 = vmatprep.subr.bf16.mxu0 %v826_v13  ;;  %406 = vmatprep.subr.bf16.mxu1 %v828_v14  ;;  %v440_v19 = vunpack.c.l.s4 %v873_v18  ;;  %s761_s7 = sshll.u32 %s1001_s6, 1  ;;  %vm484_vm1 = vcmask 1041408   ;;  %vm564_vm2 = vcmask 1040384  }
  0x22   : > { %s279_s10 = scalar_lea.vmem %s992_s2, %s761_s7  ;;  %s289_s14 = scalar_lea.vmem %s993_s3, %s761_s7 }
  0x23   : > { %v441_v21 = vunpack.c.0.s8 %v440_v19 }
  0x24   : > { %366 = vmatpush1.bf16.msra.mxu0 %v830_v15  ;;  %407 = vmatpush1.bf16.msra.mxu1 %v831_v16 }
  0x25   : > { %v946_v25 = vsub.s32 %v441_v21, %v443_v22 }
  0x27   : > { %772 = vmatmul.mubr.msk.bf16.vlgmr.msra.gmra.mxu0 %vm347_vm0, %v298_v17  ;;  %773 = vmatmul.mubr.msk.bf16.vlgmr.msra.gmra.mxu1 %vm347_vm0, %v298_v17 }
  0xe7   : > { %v385_v23 = vpop.f32.mrf.mxu0  ;;  %v426_v24 = vpop.f32.mrf.mxu1 }
  0xe9   : > { %v387_v26 = vpop.f32.mrf.mxu0  ;;  %v428_v27 = vpop.f32.mrf.mxu1 }
  0xea   : > { %v437_v28 = vcombine.low %v385_v23, %v387_v26  ;;  %v438_v29 = vcombine.low %v426_v24, %v428_v27 }
  0xeb   : > { %v389_v30 = vpop.f32.mrf.mxu0  ;;  %v430_v31 = vpop.f32.mrf.mxu1 }
  0xec   : > { %v445_v32 = vrot.slane %v437_v28, %v946_v25  ;;  %v452_v33 = vrot.slane %v438_v29, %v946_v25 }
  0xed   : > { %v390_v34 = vpop.f32.mrf.mxu0  ;;  %v431_v35 = vpop.f32.mrf.mxu1 }
  0xee   : > { %v453_v36 = vcombine.low %v445_v32, %v452_v33  ;;  %v777_v37 = vcombine.low %v452_v33, %v452_v33 }
  0xf0   : > { %461 = vst [vmem:[%s279_s10] sm:$0xff] %v453_v36  ;;  %v470_v38 = vrot.slane %v453_v36, %v946_v25  ;;  %v477_v39 = vrot.slane %v777_v37, %v946_v25  ;;  %v513_v40 = vmul.f32 %v453_v36, %v453_v36 }
  0xf2   : > { %v478_v41 = vcombine.high %v470_v38, %v470_v38  ;;  %v479_v42 = vcombine.high %v477_v39, %v477_v39  ;;  %v485_v43 = vsel %vm484_vm1, %v470_v38, 0.0  ;;  %v499_v44 = vsel %vm484_vm1, %v477_v39, 0.0 }
  0xf3   : > { %v486_v45 = vrot.slane %v485_v43, 4  ;;  %v500_v46 = vrot.slane %v499_v44, 4  ;;  %v515_v47 = vcombine.high %v513_v40, %v513_v40  ;;  %v522_v48 = vrot.slane %v513_v40, %v946_v25 }
  0xf4   : > { %v492_v49 = vsel %vm484_vm1, %v478_v41, 0.0  ;;  %v506_v50 = vsel %vm484_vm1, %v479_v42, 0.0 }
  0xf5   : > { %v487_v51 = vadd.f32 %v486_v45, %v485_v43  ;;  %v493_v52 = vrot.slane %v492_v49, 4  ;;  %v501_v53 = vadd.f32 %v500_v46, %v499_v44  ;;  %v507_v54 = vrot.slane %v506_v50, 4 }
  0xf6   : > { %v529_v55 = vrot.slane %v515_v47, %v946_v25  ;;  %v530_v56 = vcombine.high %v522_v48, %v522_v48  ;;  %v536_v57 = vsel %vm484_vm1, %v522_v48, 0.0 }
  0xf7   : > { %v488_v58 = vrot.slane %v487_v51, 2  ;;  %v494_v59 = vadd.f32 %v493_v52, %v492_v49  ;;  %v508_v60 = vadd.f32 %v507_v54, %v506_v50  ;;  %v537_v62 = vrot.slane %v536_v57, 4 }
  0xf8   : > { %v531_v61 = vcombine.high %v529_v55, %v529_v55  ;;  %v543_v63 = vsel %vm484_vm1, %v530_v56, 0.0  ;;  %v550_v0 = vsel %vm484_vm1, %v529_v55, 0.0  ;;  %v502_v2 = vrot.slane %v501_v53, 2 }
  0xf9   : > { %v495_v1 = vrot.slane %v494_v59, 2  ;;  %v509_v3 = vrot.slane %v508_v60, 2  ;;  %v538_v4 = vadd.f32 %v537_v62, %v536_v57  ;;  %v544_v5 = vrot.slane %v543_v63, 4 }
  0xfa   : > { %v551_v6 = vrot.slane %v550_v0, 4  ;;  %v557_v7 = vsel %vm484_vm1, %v531_v61, 0.0  ;;  %v489_v8 = vadd.f32 %v488_v58, %v487_v51  ;;  %v503_v14 = vadd.f32 %v502_v2, %v501_v53 }
  0xfb   : > { %v496_v9 = vadd.f32 %v495_v1, %v494_v59  ;;  %v539_v10 = vrot.slane %v538_v4, 2  ;;  %v545_v11 = vadd.f32 %v544_v5, %v543_v63  ;;  %v558_v13 = vrot.slane %v557_v7, 4 }
  0xfc   : > { %v552_v12 = vadd.f32 %v551_v6, %v550_v0  ;;  %v510_v15 = vadd.f32 %v509_v3, %v508_v60  ;;  %v490_v20 = vrot.slane %v489_v8, 1  ;;  %v504_v27 = vrot.slane %v503_v14, 1 }
  0xfd   : > { %v540_v16 = vadd.f32 %v539_v10, %v538_v4  ;;  %v546_v17 = vrot.slane %v545_v11, 2  ;;  %v559_v19 = vadd.f32 %v558_v13, %v557_v7  ;;  %v497_v21 = vrot.slane %v496_v9, 1 }
  0xfe   : > { %v553_v18 = vrot.slane %v552_v12, 2  ;;  %v511_v28 = vrot.slane %v510_v15, 1  ;;  %v491_v33 = vadd.f32 %v490_v20, %v489_v8  ;;  %v505_v38 = vadd.f32 %v504_v27, %v503_v14 }
  0xff   : > { %v541_v22 = vrot.slane %v540_v16, 1  ;;  %v547_v23 = vadd.f32 %v546_v17, %v545_v11  ;;  %v560_v26 = vrot.slane %v559_v19, 2  ;;  %v498_v34 = vadd.f32 %v497_v21, %v496_v9 }
 0x100   : > { %v554_v24 = vadd.f32 %v553_v18, %v552_v12  ;;  %v512_v39 = vadd.f32 %v511_v28, %v510_v15 }
 0x101   : > { %v542_v29 = vadd.f32 %v541_v22, %v540_v16  ;;  %v548_v30 = vrot.slane %v547_v23, 1  ;;  %v561_v32 = vadd.f32 %v560_v26, %v559_v19 }
 0x102   : > { %v555_v31 = vrot.slane %v554_v24, 1 }
 0x103   : > { %v549_v35 = vadd.f32 %v548_v30, %v547_v23  ;;  %v562_v37 = vrot.slane %v561_v32, 1  ;;  %v565_v41 = vsel %vm564_vm2, %v491_v33, %v542_v29 }
 0x104   : > { %v556_v36 = vadd.f32 %v555_v31, %v554_v24 }
 0x105   : > { %v563_v40 = vadd.f32 %v562_v37, %v561_v32  ;;  %v566_v42 = vsel %vm564_vm2, %v498_v34, %v549_v35 }
 0x106   : > { %v573_v43 = vcombine.low %v565_v41, %v566_v42  ;;  %v567_v44 = vsel %vm564_vm2, %v505_v38, %v556_v36 }
 0x107   : > { %v568_v45 = vsel %vm564_vm2, %v512_v39, %v563_v40 }
 0x108   : > { %v574_v46 = vcombine.low %v567_v44, %v568_v45  ;;  %v581_v47 = vrot.slane %v573_v43, %v946_v25 }
 0x10a   : > { %v588_v48 = vrot.slane %v574_v46, %v946_v25 }
 0x10c   : > { %v589_v49 = vcombine.low %v581_v47, %v588_v48 }
 0x10e   : > { %591 = vst [vmem:[%s289_s14] sm:$0xff] %v589_v49 }
 0x10f PF: > { %s14_s16 = sadd.s32 1, %s870_s16   ;;  %s994_s12 = smov %s858_s13 }
 0x110   : > { %p11_p10 = scmp.ge.s32.totalorder %s14_s16, 6   ;;  %s995_s13 = smov %s929_s20 }
 0x111   : > { %s996_s14 = smov %s866_s15  ;;  %s997_s15 = smov %s999_s17 }
 0x112   :  { %13 = sbr.rel (!%p11_p10) target bundleno = 3 (0x3), region = 109 }

// kernel: tile.33
= control target key start
LH: loop header
LB: loop body
LE: loop exit
PB: predicated region body
PF: predicated region fallthrough
CT: control target
= control target key end

     0   :  { %s22_s0 = inlined_call_operand.vmem [shape: f32[64], index: 0, kind: input, shape index: {}]   ;;  %s23_s1 = inlined_call_operand.vmem [shape: f32[4,64], index: 1, kind: output, shape index: {}]  }
   0x1   :  { %v4_v0 = vld [vmem:[%s22_s0] ss:$0 sm:$0xff] }
   0x2   :  { %5 = vst [vmem:[%s23_s1] sm:$0xf] %v4_v0 }

// kernel: tile.34
= control target key start
LH: loop header
LB: loop body
LE: loop exit
PB: predicated region body
PF: predicated region fallthrough
CT: control target
= control target key end

     0   :  { %s7_s8 = smov 3  ;;  %vm9_vm0 = vcmask 523264   ;;  %s34_s9 = smov 64   ;;  %vm16_vm1 = vcmask 1048064   ;;  %s54_s0 = inlined_call_operand.vmem [shape: f32[4,64], index: 0, kind: input, shape index: {}]   ;;  %s55_s1 = inlined_call_operand.vmem [shape: f32[1,256], index: 1, kind: output, shape index: {}]  }
   0x1   :  { %v5_v0 = vld [vmem:[%s54_s0] sm:$0xf]  ;;  %s12_s0 = smov 3 }
   0x2   :  { %6 = vst [vmem:[#allocation1] sm:$0xf] %v5_v0 }
   0x9   :  { %v13_v1 = vld [vmem:[#allocation1 + $0x1] ss:$2 sm:%s12_s0]   ;;  %v8_v2 = vld [vmem:[#allocation1] ss:$2 sm:%s7_s8]  }
   0xa   :  { %14 = vrot.lane.b32.xlu0 %v13_v1, %s34_s9  ;;  %10 = vst.msk [vmem:[#allocation0] ss:$8 sm:$0x3] %vm9_vm0, %v8_v2  }
  0x7c   :  { %v15_v3 = vpop.permute.xlu0 %14  }
  0x7d   :  { %17 = vst.msk [vmem:[#allocation0] ss:$8 sm:$0x3] %vm16_vm1, %v15_v3  }
  0x84   :  { %v22_v4 = vld [vmem:[#allocation0] sm:$0x1]  ;;  %v27_v5 = vld [vmem:[#allocation0 + $0x8] sm:$0x1] }
  0x85   :  { %25 = vst [vmem:[%s55_s1] sm:$0x1] %v22_v4  ;;  %32 = vst [vmem:[%s55_s1 + $0x1] sm:$0x1] %v27_v5 }

// kernel: generator_forward.8
= control target key start
LH: loop header
LB: loop body
LE: loop exit
PB: predicated region body
PF: predicated region fallthrough
CT: control target
= control target key end

     0   :  { %v24_v0 = vlaneseq  ;;  %s156_s1 = inlined_call_operand.vmem [shape: f32[1,256], index: 1, kind: input, shape index: {}]   ;;  %s157_s2 = inlined_call_operand.vmem [shape: f32[1,256], index: 2, kind: input, shape index: {}]   ;;  %s158_s0 = inlined_call_operand.vmem [shape: f32[32,256], index: 0, kind: input, shape index: {}]   ;;  %s159_s3 = inlined_call_operand.vmem [shape: f32[32,256], index: 3, kind: output, shape index: {}]  }
   0x1   :  { %v22_v2 = vld [vmem:[%s156_s1] sm:$0x3]  ;;  %v15_v6 = vld [vmem:[%s158_s0 + $0x8] sm:$0xff]  ;;  %v16_v8 = vld [vmem:[%s158_s0 + $0x10] sm:$0xff] }
   0x2   :  { %v25_v1 = vshrl.u32 %v24_v0, 7  ;;  %v42_v3 = vld [vmem:[%s157_s2] sm:$0x3]  ;;  %v17_v9 = vld [vmem:[%s158_s0 + $0x18] sm:$0xff]  ;;  %v19_v15 = vld [vmem:[%s158_s0 + $0x28] sm:$0xff] }
   0x3   :  { %v14_v4 = vld [vmem:[%s158_s0] sm:$0xff]  ;;  %v20_v16 = vld [vmem:[%s158_s0 + $0x30] sm:$0xff]  ;;  %v21_v17 = vld [vmem:[%s158_s0 + $0x38] sm:$0xff] }
   0x4   :  { %v26_v5 = vsub.s32 0, %v25_v1  ;;  %v30_v7 = vsub.s32 1, %v25_v1  ;;  %v18_v10 = vld [vmem:[%s158_s0 + $0x20] sm:$0xff] }
   0x6   :  { %v27_v11 = vrot.slane %v22_v2, %v26_v5  ;;  %v47_v12 = vrot.slane %v42_v3, %v26_v5  ;;  %v31_v13 = vrot.slane %v22_v2, %v30_v7  ;;  %v51_v14 = vrot.slane %v42_v3, %v30_v7 }
   0x8   :  { %v34_v18 = vmul.f32 %v27_v11, %v14_v4  ;;  %v35_v19 = vmul.f32 %v31_v13, %v15_v6  ;;  %v36_v20 = vmul.f32 %v27_v11, %v16_v8  ;;  %v37_v21 = vmul.f32 %v31_v13, %v17_v9 }
   0x9   :  { %v38_v22 = vmul.f32 %v27_v11, %v18_v10  ;;  %v39_v23 = vmul.f32 %v31_v13, %v19_v15  ;;  %v40_v24 = vmul.f32 %v27_v11, %v20_v16  ;;  %v41_v25 = vmul.f32 %v31_v13, %v21_v17 }
   0xa   :  { %v54_v26 = vadd.f32 %v47_v12, %v34_v18  ;;  %v55_v27 = vadd.f32 %v51_v14, %v35_v19  ;;  %v56_v28 = vadd.f32 %v47_v12, %v36_v20  ;;  %v57_v29 = vadd.f32 %v51_v14, %v37_v21 }
   0xb   :  { %v58_v30 = vadd.f32 %v47_v12, %v38_v22  ;;  %v59_v31 = vadd.f32 %v51_v14, %v39_v23  ;;  %v60_v32 = vadd.f32 %v47_v12, %v40_v24  ;;  %v61_v33 = vadd.f32 %v51_v14, %v41_v25 }
   0xc   :  { %v62_v34 = vmax.f32 %v54_v26, 0.0  ;;  %v63_v35 = vmax.f32 %v55_v27, 0.0  ;;  %v64_v36 = vmax.f32 %v56_v28, 0.0  ;;  %v65_v37 = vmax.f32 %v57_v29, 0.0 }
   0xd   :  { %v66_v38 = vmax.f32 %v58_v30, 0.0  ;;  %v67_v39 = vmax.f32 %v59_v31, 0.0  ;;  %v68_v40 = vmax.f32 %v60_v32, 0.0  ;;  %v69_v41 = vmax.f32 %v61_v33, 0.0 }
   0xe   :  { %70 = vst [vmem:[%s159_s3] sm:$0xff] %v62_v34  ;;  %71 = vst [vmem:[%s159_s3 + $0x8] sm:$0xff] %v63_v35 }
   0xf   :  { %72 = vst [vmem:[%s159_s3 + $0x10] sm:$0xff] %v64_v36  ;;  %73 = vst [vmem:[%s159_s3 + $0x18] sm:$0xff] %v65_v37 }
  0x10   :  { %74 = vst [vmem:[%s159_s3 + $0x20] sm:$0xff] %v66_v38  ;;  %75 = vst [vmem:[%s159_s3 + $0x28] sm:$0xff] %v67_v39 }
  0x11   :  { %76 = vst [vmem:[%s159_s3 + $0x30] sm:$0xff] %v68_v40  ;;  %77 = vst [vmem:[%s159_s3 + $0x38] sm:$0xff] %v69_v41 }

// kernel: generator_forward.7
= control target key start
LH: loop header
LB: loop body
LE: loop exit
PB: predicated region body
PF: predicated region fallthrough
CT: control target
= control target key end

     0   :  { %s1298_s12 = smov 0   ;;  %s1300_s13 = smov 0   ;;  %s1452_s0 = inlined_call_operand.vmem [shape: bf16[32,1152], index: 0, kind: input, shape index: {}]   ;;  %s1453_s1 = inlined_call_operand.vmem [shape: bf16[1152,256], index: 1, kind: input, shape index: {}]   ;;  %s1454_s2 = inlined_call_operand.vmem [shape: f32[32,256], index: 2, kind: output, shape index: {0}]   ;;  %s1455_s3 = inlined_call_operand.vmem [shape: f32[1,2,256], index: 3, kind: output, shape index: {1}]  }
   0x1   :  { %s1302_s14 = smov 0   ;;  %s1304_s15 = smov 0  }
   0x2   :  { %s1306_s16 = smov 0  }
   0x3 LB: > { %s26_s17 = sadd.s32 1, %s1270_s15  ;;  %p49_p1 = scmp.ne.s32.totalorder %s1262_s13, %s1258_s12  ;;  %s1274_s16 = sphi %s1306_s16, %s14_s16   ;;  %s1270_s15 = sphi %s1304_s15, %s1459_s15   ;;  %s1266_s14 = sphi %s1302_s14, %s1458_s14   ;;  %s1262_s13 = sphi %s1300_s13, %s1457_s13   ;;  %s1258_s12 = sphi %s1298_s12, %s1456_s12  }
   0x4   : > { %p27_p0 = scmp.ge.s32.totalorder %s26_s17, 3  ;;  %p50_p2 = scmp.eq.s32.totalorder %s1274_s16, 0 }
   0x5   : > { %s42_s19 = sadd.s32 1, %s1262_s13  ;;  %p1034_p5 = scmp.ge.s32.totalorder %s1274_s16, 3 }
   0x6   : > { %s1461_s17 = smov (%p27_p0, %s26_s17), 0  ;;  %p51_p3 = por %p50_p2, %p49_p1 }
   0x7   : > { %s38_s18 = ssub.s32 %s1270_s15, %s1461_s17  ;;  %159 = sbr.rel (%p1034_p5) target bundleno = 21 (0x15), region = 16 }
   0x8   : > { %p40_p4 = scmp.eq.s32.totalorder %s38_s18, 0 }
   0xa   : > { %s1333_s20 = scalar_select %p40_p4, %s1262_s13, %s42_s19  }
   0xc   : > { %162 = sbr.rel (!%p51_p3) target bundleno = 21 (0x15), region = 20  ;;  %s164_s21 = sand.u32 (%p51_p3), 1, %s1262_s13  }
   0xd   : > { %s1110_s22 = smul.u32 (%p51_p3), 12, %s1270_s15 }
   0xe   : > { %s1112_s23 = smul.u32 (%p51_p3), 48, %s164_s21 }
   0xf   : > { %s172_s26 = scalar_lea.vmem (%p51_p3), %s1452_s0, %s1110_s22 }
  0x10   : > { %v187_v0 = vld [vmem:[%s172_s26] sm:$0xff] (%p51_p3)  ;;  %v191_v2 = vld [vmem:[%s172_s26 + $0x48] sm:$0xff] (%p51_p3)  ;;  %s166_s27 = scalar_lea.vmem (%p51_p3), [#allocation3], %s1112_s23  ;;  %v1040_v6 = vld [vmem:[%s172_s26 + $0x50] sm:$0xf] (%p51_p3) }
  0x11   : > { %v189_v1 = vld [vmem:[%s172_s26 + $0x24] sm:$0xff]  ;;  %188 = vst [vmem:[%s166_s27] sm:$0xff] %v187_v0  ;;  %192 = vst [vmem:[%s166_s27 + $0x18] sm:$0xff] %v191_v2  ;;  %v193_v3 = vld [vmem:[%s172_s26 + $0x6c] sm:$0xff] }
  0x12   : > { %190 = vst [vmem:[%s166_s27 + $0xc] sm:$0xff] %v189_v1  ;;  %v1036_v4 = vld [vmem:[%s172_s26 + $0x8] sm:$0xf]  ;;  %v1038_v5 = vld [vmem:[%s172_s26 + $0x2c] sm:$0xf]  ;;  %194 = vst [vmem:[%s166_s27 + $0x24] sm:$0xff] %v193_v3 }
  0x13   : > { %1037 = vst [vmem:[%s166_s27 + $0x8] sm:$0xf] %v1036_v4  ;;  %1039 = vst [vmem:[%s166_s27 + $0x14] sm:$0xf] %v1038_v5  ;;  %v1042_v7 = vld [vmem:[%s172_s26 + $0x74] sm:$0xf] }
  0x14   : > { %1041 = vst [vmem:[%s166_s27 + $0x20] sm:$0xf] %v1040_v6  ;;  %1043 = vst [vmem:[%s166_s27 + $0x2c] sm:$0xf] %v1042_v7 }
  0x15 PF: > { %p1044_p6 = scmp.ge.s32.totalorder %s1274_s16, 1  ;;  %p230_p7 = scmp.lt.s32.totalorder %s1274_s16, 4 }
  0x17   : > { %p231_p8 = pnand %p1044_p6, %p230_p7 }
  0x18   : > { %s237_s28 = sand.u32 (!%p231_p8), 1, %s1258_s12   ;;  %s286_s29 = smul.u32 (!%p231_p8), 48, %s1266_s14 }
  0x19   : > { %234 = sbr.rel (%p231_p8) target bundleno = 344 (0x158), region = 50  ;;  %p1047_p10 = scmp.ne.s32.totalorder (!%p231_p8), %s1266_s14, 0 }
  0x1a   : > { %s1113_s30 = smul.u32 (!%p231_p8), 48, %s237_s28  ;;  %p288_p9 = scmp.lt.s32.totalorder (!%p231_p8), %s286_s29, 143 }
  0x1c   : > { %s1350_s8 = scalar_lea.vmem (!%p231_p8), [#allocation3], %s1113_s30 }
  0x1e   : > { %s1463_s29 = smov (!%p288_p9, %s286_s29), 143  ;;  %324 = sbr.rel (%p1047_p10) target bundleno = 40 (0x28), region = 58 }
  0x1f   : > { %s1111_s4 = sshll.u32 %s1463_s29, 3 }
  0x20   : > { %s1348_s7 = scalar_lea.vmem %s1453_s1, %s1111_s4 }
  0x23   : > { %v1276_v8 = vmov 0.0  }
  0x24   : > { %325 = vst [vmem:[#allocation2 + $0x30] sm:$0xff] %v1276_v8  ;;  %326 = vst [vmem:[#allocation2] sm:$0xff] %v1276_v8 }
  0x25   : > { %327 = vst [vmem:[#allocation2 + $0x18] sm:$0xff] %v1276_v8  ;;  %328 = vst [vmem:[#allocation2 + $0x10] sm:$0xff] %v1276_v8 }
  0x26   : > { %329 = vst [vmem:[#allocation2 + $0x8] sm:$0xff] %v1276_v8  ;;  %330 = vst [vmem:[#allocation2 + $0x20] sm:$0xff] %v1276_v8 }
  0x27   : > { %331 = vst [vmem:[#allocation2 + $0x28] sm:$0xff] %v1276_v8  ;;  %332 = vst [vmem:[#allocation2 + $0x38] sm:$0xff] %v1276_v8 }
  0x28 PF: > { %v1156_v9 = vld [vmem:[%s1348_s7 + $0x74] ss:$8 sps:$4 sm:$0xff]   ;;  %v1158_v10 = vld [vmem:[%s1348_s7 + $0x70] ss:$8 sps:$4 sm:$0xff]   ;;  %v1277_v11 = vmov 0   ;;  %p1102_p11 = scmp.ne.s32.totalorder %s1266_s14, 2 }
  0x29   : > { %754 = vmatprep.mubr.bf16.mxu1 %v1277_v11  ;;  %669 = vmatprep.subr.bf16.mxu0 %v1156_v9  ;;  %v1159_v12 = vld [vmem:[%s1348_s7 + $0x64] ss:$8 sps:$4 sm:$0xff]   ;;  %v1161_v13 = vld [vmem:[%s1348_s7 + $0x60] ss:$8 sps:$4 sm:$0xff]   ;;  %v1162_v14 = vld [vmem:[%s1348_s7 + $0x54] ss:$8 sps:$4 sm:$0xff]  }
  0x2a   : > { %670 = vmatpush1.bf16.msra.mxu0 %v1158_v10  ;;  %v1164_v15 = vld [vmem:[%s1348_s7 + $0x50] ss:$8 sps:$4 sm:$0xff]   ;;  %v1165_v16 = vld [vmem:[%s1348_s7 + $0x44] ss:$8 sps:$4 sm:$0xff]   ;;  %v1177_v17 = vld [vmem:[%s1348_s7 + $0x174] ss:$8 sps:$4 sm:$0xff]  }
  0x2b   : > { %671 = vmatprep.subr.bf16.mxu0 %v1159_v12  ;;  %v1179_v18 = vld [vmem:[%s1348_s7 + $0x170] ss:$8 sps:$4 sm:$0xff]   ;;  %v1167_v19 = vld [vmem:[%s1348_s7 + $0x40] ss:$8 sps:$4 sm:$0xff]   ;;  %v1168_v20 = vld [vmem:[%s1348_s7 + $0x34] ss:$8 sps:$4 sm:$0xff]   ;;  %722 = vmatprep.subr.bf16.mxu1 %v1177_v17 }
  0x2c   : > { %v1183_v21 = vld [vmem:[%s1348_s7 + $0x164] ss:$8 sps:$4 sm:$0xff]   ;;  %723 = vmatpush1.bf16.msra.mxu1 %v1179_v18  ;;  %v1185_v22 = vld [vmem:[%s1348_s7 + $0x160] ss:$8 sps:$4 sm:$0xff]   ;;  %v1170_v23 = vld [vmem:[%s1348_s7 + $0x30] ss:$8 sps:$4 sm:$0xff]  }
  0x2d   : > { %724 = vmatprep.subr.bf16.mxu1 %v1183_v21  ;;  %v1189_v24 = vld [vmem:[%s1348_s7 + $0x154] ss:$8 sps:$4 sm:$0xff]   ;;  %v1171_v25 = vld [vmem:[%s1348_s7 + $0x24] ss:$8 sps:$4 sm:$0xff]   ;;  %v1191_v26 = vld [vmem:[%s1348_s7 + $0x150] ss:$8 sps:$4 sm:$0xff]  }
  0x2e   : > { %672 = vmatpush1.bf16.msra.mxu0 %v1161_v13  ;;  %v1195_v27 = vld [vmem:[%s1348_s7 + $0x144] ss:$8 sps:$4 sm:$0xff]   ;;  %v1173_v28 = vld [vmem:[%s1348_s7 + $0x20] ss:$8 sps:$4 sm:$0xff]   ;;  %v1174_v29 = vld [vmem:[%s1348_s7 + $0x14] ss:$8 sps:$4 sm:$0xff]  }
  0x2f   : > { %673 = vmatprep.subr.bf16.mxu0 %v1162_v14  ;;  %v1197_v30 = vld [vmem:[%s1348_s7 + $0x140] ss:$8 sps:$4 sm:$0xff]   ;;  %v1201_v31 = vld [vmem:[%s1348_s7 + $0x134] ss:$8 sps:$4 sm:$0xff]   ;;  %v1176_v32 = vld [vmem:[%s1348_s7 + $0x10] ss:$8 sps:$4 sm:$0xff]  }
  0x30   : > { %725 = vmatpush1.bf16.msra.mxu1 %v1185_v22  ;;  %v1180_v33 = vld [vmem:[%s1348_s7 + $0x4] ss:$8 sps:$4 sm:$0xff]   ;;  %v1203_v34 = vld [vmem:[%s1348_s7 + $0x130] ss:$8 sps:$4 sm:$0xff]   ;;  %v1182_v36 = vld [vmem:[%s1348_s7] ss:$8 sps:$4 sm:$0xff]  }
  0x31   : > { %726 = vmatprep.subr.bf16.mxu1 %v1189_v24  ;;  %v1207_v35 = vld [vmem:[%s1348_s7 + $0x124] ss:$8 sps:$4 sm:$0xff]   ;;  %v1186_v37 = vld [vmem:[%s1348_s7 + $0xf4] ss:$8 sps:$4 sm:$0xff]   ;;  %v1209_v38 = vld [vmem:[%s1348_s7 + $0x120] ss:$8 sps:$4 sm:$0xff]  }
  0x32   : > { %674 = vmatpush1.bf16.msra.mxu0 %v1164_v15  ;;  %v1213_v39 = vld [vmem:[%s1348_s7 + $0x114] ss:$8 sps:$4 sm:$0xff]   ;;  %v1188_v40 = vld [vmem:[%s1348_s7 + $0xf0] ss:$8 sps:$4 sm:$0xff]   ;;  %v1192_v41 = vld [vmem:[%s1348_s7 + $0xe4] ss:$8 sps:$4 sm:$0xff]  }
  0x33   : > { %675 = vmatprep.subr.bf16.mxu0 %v1165_v16  ;;  %v1215_v42 = vld [vmem:[%s1348_s7 + $0x110] ss:$8 sps:$4 sm:$0xff]   ;;  %v1219_v43 = vld [vmem:[%s1348_s7 + $0x104] ss:$8 sps:$4 sm:$0xff]   ;;  %v1194_v45 = vld [vmem:[%s1348_s7 + $0xe0] ss:$8 sps:$4 sm:$0xff]  }
  0x34   : > { %727 = vmatpush1.bf16.msra.mxu1 %v1191_v26  ;;  %v1231_v44 = vld [vmem:[%s1350_s8 + $0x4] ss:$12 sps:$4 sm:$0xff]   ;;  %v1225_v50 = vld [vmem:[%s1350_s8 + $0x8] ss:$12 sps:$4 sm:$0xff]   ;;  %v1232_v55 = vld [vmem:[%s1350_s8 + $0x20] ss:$12 sps:$4 sm:$0xff]  }
  0x35   : > { %728 = vmatprep.subr.bf16.mxu1 %v1195_v27  ;;  %v1198_v46 = vld [vmem:[%s1348_s7 + $0xd4] ss:$8 sps:$4 sm:$0xff]   ;;  %701 = vmatprep.mubr.bf16.mxu0 %v1231_v44  ;;  %v1221_v47 = vld [vmem:[%s1348_s7 + $0x100] ss:$8 sps:$4 sm:$0xff]   ;;  %v1200_v48 = vld [vmem:[%s1348_s7 + $0xd0] ss:$8 sps:$4 sm:$0xff]  }
  0x36   : > { %676 = vmatpush1.bf16.msra.mxu0 %v1167_v19  ;;  %v1204_v49 = vld [vmem:[%s1348_s7 + $0xc4] ss:$8 sps:$4 sm:$0xff]   ;;  %v1206_v51 = vld [vmem:[%s1348_s7 + $0xc0] ss:$8 sps:$4 sm:$0xff]   ;;  %v1210_v52 = vld [vmem:[%s1348_s7 + $0xb4] ss:$8 sps:$4 sm:$0xff]  }
  0x37   : > { %677 = vmatprep.subr.bf16.mxu0 %v1168_v20  ;;  %v1212_v53 = vld [vmem:[%s1348_s7 + $0xb0] ss:$8 sps:$4 sm:$0xff]   ;;  %v1216_v54 = vld [vmem:[%s1348_s7 + $0xa4] ss:$8 sps:$4 sm:$0xff]   ;;  %v1218_v56 = vld [vmem:[%s1348_s7 + $0xa0] ss:$8 sps:$4 sm:$0xff]  }
  0x38   : > { %729 = vmatpush1.bf16.msra.mxu1 %v1197_v30  ;;  %v1222_v57 = vld [vmem:[%s1348_s7 + $0x94] ss:$8 sps:$4 sm:$0xff]   ;;  %v1224_v58 = vld [vmem:[%s1348_s7 + $0x90] ss:$8 sps:$4 sm:$0xff]   ;;  %v1226_v59 = vld [vmem:[%s1348_s7 + $0x84] ss:$8 sps:$4 sm:$0xff]  }
  0x39   : > { %730 = vmatprep.subr.bf16.mxu1 %v1201_v31  ;;  %v1228_v60 = vld [vmem:[%s1348_s7 + $0x80] ss:$8 sps:$4 sm:$0xff]   ;;  %v333_v4 = vld [vmem:[#allocation2 + $0x30] sm:$0xff]  ;;  %v335_v12 = vld [vmem:[#allocation2 + $0x18] sm:$0xff] }
  0x3a   : > { %678 = vmatpush1.bf16.msra.mxu0 %v1170_v23  ;;  %v1229_v61 = vld [vmem:[%s1350_s8] ss:$12 sps:$4 sm:$0xff]   ;;  %v1233_v62 = vld [vmem:[%s1350_s8 + $0x1c] ss:$12 sps:$4 sm:$0xff]   ;;  %v1235_v63 = vld [vmem:[%s1350_s8 + $0x18] ss:$12 sps:$4 sm:$0xff]  }
  0x3b   : > { %679 = vmatprep.subr.bf16.mxu0 %v1171_v25  ;;  %v334_v7 = vld [vmem:[#allocation2] sm:$0xff]  ;;  %v336_v17 = vld [vmem:[#allocation2 + $0x10] sm:$0xff]  ;;  %v337_v21 = vld [vmem:[#allocation2 + $0x8] sm:$0xff] }
  0x3c   : > { %731 = vmatpush1.bf16.msra.mxu1 %v1203_v34  ;;  %v338_v26 = vld [vmem:[#allocation2 + $0x20] sm:$0xff]  ;;  %v339_v30 = vld [vmem:[#allocation2 + $0x28] sm:$0xff] }
  0x3d   : > { %732 = vmatprep.subr.bf16.mxu1 %v1207_v35  ;;  %v340_v35 = vld [vmem:[#allocation2 + $0x38] sm:$0xff] }
  0x3e   : > { %680 = vmatpush1.bf16.msra.mxu0 %v1173_v28 }
  0x3f   : > { %681 = vmatprep.subr.bf16.mxu0 %v1174_v29 }
  0x40   : > { %733 = vmatpush1.bf16.msra.mxu1 %v1209_v38 }
  0x41   : > { %734 = vmatprep.subr.bf16.mxu1 %v1213_v39 }
  0x42   : > { %682 = vmatpush1.bf16.msra.mxu0 %v1176_v32 }
  0x43   : > { %683 = vmatprep.subr.bf16.mxu0 %v1180_v33 }
  0x44   : > { %735 = vmatpush1.bf16.msra.mxu1 %v1215_v42 }
  0x45   : > { %736 = vmatprep.subr.bf16.mxu1 %v1219_v43 }
  0x46   : > { %684 = vmatpush1.bf16.msra.mxu0 %v1182_v36 }
  0x47   : > { %685 = vmatprep.subr.bf16.mxu0 %v1186_v37 }
  0x48   : > { %737 = vmatpush1.bf16.msra.mxu1 %v1221_v47 }
  0x4a   : > { %686 = vmatpush2.bf16.msra.mxu0 %v1188_v40 }
  0x4b   : > { %687 = vmatprep.subr.bf16.mxu0 %v1192_v41  ;;  %755 = vmatmul.mubr.bf16.vlgmr.msra.gmra.mxu1 %v1225_v50 }
  0x4c   : > { %764 = vmatprep.mubr.bf16.mxu1 %v1277_v11 }
  0x4e   : > { %688 = vmatpush2.bf16.msra.mxu0 %v1194_v45 }
  0x4f   : > { %689 = vmatprep.subr.bf16.mxu0 %v1198_v46 }
  0x52   : > { %690 = vmatpush2.bf16.msra.mxu0 %v1200_v48 }
  0x53   : > { %691 = vmatprep.subr.bf16.mxu0 %v1204_v49  ;;  %765 = vmatmul.mubr.bf16.gmra.mxu1 %v1232_v55 }
  0x56   : > { %692 = vmatpush2.bf16.msra.mxu0 %v1206_v51 }
  0x57   : > { %693 = vmatprep.subr.bf16.mxu0 %v1210_v52 }
  0x5a   : > { %694 = vmatpush2.bf16.msra.mxu0 %v1212_v53 }
  0x5b   : > { %695 = vmatprep.subr.bf16.mxu0 %v1216_v54 }
  0x5e   : > { %696 = vmatpush2.bf16.msra.mxu0 %v1218_v56 }
  0x5f   : > { %697 = vmatprep.subr.bf16.mxu0 %v1222_v57 }
  0x62   : > { %698 = vmatpush2.bf16.msra.mxu0 %v1224_v58 }
  0x63   : > { %699 = vmatprep.subr.bf16.mxu0 %v1226_v59 }
  0x66   : > { %700 = vmatpush2.bf16.msra.mxu0 %v1228_v60 }
  0x69   : > { %702 = vmatmul.mubr.bf16.vlgmr.msra.gmra.mxu0 %v1229_v61 }
  0x6a   : > { %711 = vmatprep.mubr.bf16.mxu0 %v1233_v62 }
  0x71   : > { %712 = vmatmul.mubr.bf16.gmra.mxu0 %v1235_v63 }
 0x10b   : > { %v756_v0 = vpop.f32.mrf.mxu1 }
 0x10d   : > { %v758_v1 = vpop.f32.mrf.mxu1 }
 0x10f   : > { %v760_v2 = vpop.f32.mrf.mxu1 }
 0x111   : > { %v762_v3 = vpop.f32.mrf.mxu1 }
 0x113   : > { %v766_v9 = vpop.f32.mrf.mxu1 }
 0x115   : > { %v768_v16 = vpop.f32.mrf.mxu1 }
 0x117   : > { %v770_v25 = vpop.f32.mrf.mxu1 }
 0x119   : > { %v772_v34 = vpop.f32.mrf.mxu1 }
 0x129   : > { %v703_v5 = vpop.f32.mrf.mxu0 }
 0x12a   : > { %v757_v6 = vadd.f32 %v756_v0, %v703_v5 }
 0x12b   : > { %v705_v8 = vpop.f32.mrf.mxu0 }
 0x12c   : > { %v775_v10 = vadd.f32 %v757_v6, %v333_v4  ;;  %v759_v11 = vadd.f32 %v758_v1, %v705_v8 }
 0x12d   : > { %v707_v13 = vpop.f32.mrf.mxu0 }
 0x12e   : > { %783 = vst [vmem:[#allocation2 + $0x30] sm:$0xff] %v775_v10  ;;  %v776_v14 = vadd.f32 %v759_v11, %v334_v7  ;;  %v761_v15 = vadd.f32 %v760_v2, %v707_v13 }
 0x12f   : > { %v709_v18 = vpop.f32.mrf.mxu0 }
 0x130   : > { %784 = vst [vmem:[#allocation2] sm:$0xff] %v776_v14  ;;  %v777_v19 = vadd.f32 %v761_v15, %v335_v12  ;;  %v763_v20 = vadd.f32 %v762_v3, %v709_v18 }
 0x131   : > { %v713_v22 = vpop.f32.mrf.mxu0 }
 0x132   : > { %785 = vst [vmem:[#allocation2 + $0x18] sm:$0xff] %v777_v19  ;;  %v778_v23 = vadd.f32 %v763_v20, %v336_v17  ;;  %v767_v24 = vadd.f32 %v766_v9, %v713_v22 }
 0x133   : > { %v715_v27 = vpop.f32.mrf.mxu0 }
 0x134   : > { %786 = vst [vmem:[#allocation2 + $0x10] sm:$0xff] %v778_v23  ;;  %v779_v28 = vadd.f32 %v767_v24, %v337_v21  ;;  %v769_v29 = vadd.f32 %v768_v16, %v715_v27 }
 0x135   : > { %v717_v31 = vpop.f32.mrf.mxu0 }
 0x136   : > { %787 = vst [vmem:[#allocation2 + $0x8] sm:$0xff] %v779_v28  ;;  %v780_v32 = vadd.f32 %v769_v29, %v338_v26  ;;  %v771_v33 = vadd.f32 %v770_v25, %v717_v31 }
 0x137   : > { %v719_v36 = vpop.f32.mrf.mxu0 }
 0x138   : > { %788 = vst [vmem:[#allocation2 + $0x20] sm:$0xff] %v780_v32  ;;  %v781_v37 = vadd.f32 %v771_v33, %v339_v30  ;;  %v773_v38 = vadd.f32 %v772_v34, %v719_v36  ;;  %794 = sbr.rel (%p1102_p11) target bundleno = 344 (0x158), region = 62 }
 0x13a   : > { %789 = vst [vmem:[#allocation2 + $0x28] sm:$0xff] %v781_v37  ;;  %v782_v39 = vadd.f32 %v773_v38, %v340_v35 }
 0x13c   : > { %790 = vst [vmem:[#allocation2 + $0x38] sm:$0xff] %v782_v39 }
 0x13d   : > { %v795_v40 = vld [vmem:[#allocation2 + $0x30] sm:$0xff]  ;;  %v796_v41 = vld [vmem:[#allocation2] sm:$0xff]  ;;  %v797_v42 = vld [vmem:[#allocation2 + $0x18] sm:$0xff]  ;;  %vm855_vm0 = vcmask 1040384  }
 0x13e   : > { %803 = vst [vmem:[%s1454_s2] sm:$0xff] %v795_v40  ;;  %v829_v43 = vmul.f32 %v795_v40, %v795_v40  ;;  %804 = vst [vmem:[%s1454_s2 + $0x8] sm:$0xff] %v796_v41  ;;  %v830_v44 = vmul.f32 %v796_v41, %v796_v41  ;;  %v811_v45 = vadd.f32 %v797_v42, %v795_v40  ;;  %v798_v47 = vld [vmem:[#allocation2 + $0x10] sm:$0xff]  ;;  %v799_v48 = vld [vmem:[#allocation2 + $0x8] sm:$0xff] }
 0x13f   : > { %805 = vst [vmem:[%s1454_s2 + $0x10] sm:$0xff] %v797_v42  ;;  %v831_v46 = vmul.f32 %v797_v42, %v797_v42  ;;  %v800_v49 = vld [vmem:[#allocation2 + $0x20] sm:$0xff]  ;;  %806 = vst [vmem:[%s1454_s2 + $0x18] sm:$0xff] %v798_v47  ;;  %v820_v50 = vadd.f32 %v798_v47, %v796_v41  ;;  %v832_v51 = vmul.f32 %v798_v47, %v798_v47 }
 0x140   : > { %807 = vst [vmem:[%s1454_s2 + $0x20] sm:$0xff] %v799_v48  ;;  %v833_v52 = vmul.f32 %v799_v48, %v799_v48  ;;  %808 = vst [vmem:[%s1454_s2 + $0x28] sm:$0xff] %v800_v49  ;;  %v834_v53 = vmul.f32 %v800_v49, %v800_v49  ;;  %v812_v57 = vadd.f32 %v811_v45, %v799_v48 }
 0x141   : > { %v801_v54 = vld [vmem:[#allocation2 + $0x28] sm:$0xff]  ;;  %v837_v56 = vadd.f32 %v831_v46, %v829_v43  ;;  %v846_v59 = vadd.f32 %v832_v51, %v830_v44  ;;  %v821_v60 = vadd.f32 %v820_v50, %v800_v49 }
 0x142   : > { %809 = vst [vmem:[%s1454_s2 + $0x30] sm:$0xff] %v801_v54  ;;  %v835_v58 = vmul.f32 %v801_v54, %v801_v54  ;;  %v813_v63 = vadd.f32 %v812_v57, %v801_v54 }
 0x143   : > { %v802_v55 = vld [vmem:[#allocation2 + $0x38] sm:$0xff]  ;;  %v838_v62 = vadd.f32 %v837_v56, %v833_v52  ;;  %v847_v0 = vadd.f32 %v846_v59, %v834_v53 }
 0x144   : > { %810 = vst [vmem:[%s1454_s2 + $0x38] sm:$0xff] %v802_v55  ;;  %v836_v61 = vmul.f32 %v802_v55, %v802_v55  ;;  %v822_v1 = vadd.f32 %v821_v60, %v802_v55  ;;  %v814_v2 = vrot.slane %v813_v63, 4 }
 0x145   : > { %v839_v3 = vadd.f32 %v838_v62, %v835_v58 }
 0x146   : > { %v823_v4 = vrot.slane %v822_v1, 4  ;;  %v848_v5 = vadd.f32 %v847_v0, %v836_v61  ;;  %v815_v6 = vadd.f32 %v814_v2, %v813_v63 }
 0x147   : > { %v840_v7 = vrot.slane %v839_v3, 4 }
 0x148   : > { %v824_v8 = vadd.f32 %v823_v4, %v822_v1  ;;  %v849_v9 = vrot.slane %v848_v5, 4  ;;  %v816_v10 = vrot.slane %v815_v6, 2 }
 0x149   : > { %v841_v11 = vadd.f32 %v840_v7, %v839_v3 }
 0x14a   : > { %v825_v12 = vrot.slane %v824_v8, 2  ;;  %v850_v13 = vadd.f32 %v849_v9, %v848_v5  ;;  %v817_v14 = vadd.f32 %v816_v10, %v815_v6 }
 0x14b   : > { %v842_v15 = vrot.slane %v841_v11, 2 }
 0x14c   : > { %v826_v16 = vadd.f32 %v825_v12, %v824_v8  ;;  %v851_v17 = vrot.slane %v850_v13, 2  ;;  %v818_v18 = vrot.slane %v817_v14, 1 }
 0x14d   : > { %v843_v19 = vadd.f32 %v842_v15, %v841_v11 }
 0x14e   : > { %v827_v20 = vrot.slane %v826_v16, 1  ;;  %v852_v21 = vadd.f32 %v851_v17, %v850_v13  ;;  %v819_v22 = vadd.f32 %v818_v18, %v817_v14 }
 0x14f   : > { %v844_v23 = vrot.slane %v843_v19, 1 }
 0x150   : > { %v828_v24 = vadd.f32 %v827_v20, %v826_v16  ;;  %v853_v25 = vrot.slane %v852_v21, 1 }
 0x151   : > { %v845_v26 = vadd.f32 %v844_v23, %v843_v19 }
 0x152   : > { %v854_v27 = vadd.f32 %v853_v25, %v852_v21 }
 0x153   : > { %v856_v28 = vsel %vm855_vm0, %v819_v22, %v845_v26 }
 0x154   : > { %v857_v29 = vsel %vm855_vm0, %v828_v24, %v854_v27 }
 0x155   : > { %v860_v30 = vcombine.low %v856_v28, %v857_v29 }
 0x157   : > { %1103 = vst.sshfl [vmem:[%s1455_s3] sm:$0x33 pattern:$0x76325410] %v860_v30 }
 0x158 PF: > { %s14_s16 = sadd.s32 1, %s1274_s16   ;;  %s1456_s12 = smov %s1262_s13 }
 0x159   : > { %p11_p12 = scmp.ge.s32.totalorder %s14_s16, 5   ;;  %s1457_s13 = smov %s1333_s20 }
 0x15a   : > { %s1458_s14 = smov %s1270_s15  ;;  %s1459_s15 = smov %s1461_s17 }
 0x15b   :  { %13 = sbr.rel (!%p11_p12) target bundleno = 3 (0x3), region = 118 }

// kernel: generator_forward.9
= control target key start
LH: loop header
LB: loop body
LE: loop exit
PB: predicated region body
PF: predicated region fallthrough
CT: control target
= control target key end

     0   :  { %s1812_s0 = inlined_call_operand.vmem [shape: bf16[128,576], index: 0, kind: input, shape index: {}]   ;;  %s1813_s1 = inlined_call_operand.vmem [shape: bf16[576,128], index: 1, kind: input, shape index: {}]   ;;  %s1814_s2 = inlined_call_operand.vmem [shape: f32[128,128], index: 2, kind: output, shape index: {0}]   ;;  %s1815_s3 = inlined_call_operand.hbm [shape: f32[1,2,128], index: 3, kind: output, shape index: {1}]  }
   0x1   :  { %v1322_v0 = vld [vmem:[%s1813_s1 + $0x78] sm:$0xff]   ;;  %v1326_v4 = vld [vmem:[%s1813_s1 + $0x70] sm:$0xff]   ;;  %v1330_v8 = vld [vmem:[%s1813_s1 + $0x68] sm:$0xff]  }
   0x2   :  { %v1323_v1 = vld [vmem:[%s1813_s1 + $0xf8] sm:$0xff]   ;;  %1149 = vmatprep.subr.bf16.mxu0 %v1322_v0  ;;  %v1327_v5 = vld [vmem:[%s1813_s1 + $0xf0] sm:$0xff]   ;;  %v1331_v9 = vld [vmem:[%s1813_s1 + $0xe8] sm:$0xff]  }
   0x3   :  { %v1324_v2 = vld [vmem:[%s1813_s1 + $0x38] sm:$0xff]   ;;  %1213 = vmatprep.subr.bf16.mxu1 %v1323_v1  ;;  %v1328_v6 = vld [vmem:[%s1813_s1 + $0x30] sm:$0xff]   ;;  %v1332_v10 = vld [vmem:[%s1813_s1 + $0x28] sm:$0xff]  }
   0x4   :  { %v1325_v3 = vld [vmem:[%s1813_s1 + $0xb8] sm:$0xff]   ;;  %1150 = vmatpush3.bf16.msra.mxu0 %v1324_v2  ;;  %v1329_v7 = vld [vmem:[%s1813_s1 + $0xb0] sm:$0xff]   ;;  %v1333_v11 = vld [vmem:[%s1813_s1 + $0xa8] sm:$0xff]  }
   0x5   :  { %1214 = vmatpush3.bf16.msra.mxu1 %v1325_v3  ;;  %1151 = vmatprep.subr.bf16.mxu0 %v1326_v4  ;;  %v1334_v12 = vld [vmem:[%s1813_s1 + $0x60] sm:$0xff]   ;;  %v1338_v16 = vld [vmem:[%s1813_s1 + $0x58] sm:$0xff]   ;;  %v1342_v20 = vld [vmem:[%s1813_s1 + $0x50] sm:$0xff]  }
   0x6   :  { %1215 = vmatprep.subr.bf16.mxu1 %v1327_v5  ;;  %v1335_v13 = vld [vmem:[%s1813_s1 + $0xe0] sm:$0xff]   ;;  %v1339_v17 = vld [vmem:[%s1813_s1 + $0xd8] sm:$0xff]   ;;  %v1343_v21 = vld [vmem:[%s1813_s1 + $0xd0] sm:$0xff]  }
   0x7   :  { %v1336_v14 = vld [vmem:[%s1813_s1 + $0x20] sm:$0xff]   ;;  %v1340_v18 = vld [vmem:[%s1813_s1 + $0x18] sm:$0xff]   ;;  %v1344_v22 = vld [vmem:[%s1813_s1 + $0x10] sm:$0xff]  }
   0x8   :  { %1152 = vmatpush3.bf16.msra.mxu0 %v1328_v6  ;;  %v1337_v15 = vld [vmem:[%s1813_s1 + $0xa0] sm:$0xff]   ;;  %v1341_v19 = vld [vmem:[%s1813_s1 + $0x98] sm:$0xff]   ;;  %v1345_v23 = vld [vmem:[%s1813_s1 + $0x90] sm:$0xff]  }
   0x9   :  { %1216 = vmatpush3.bf16.msra.mxu1 %v1329_v7  ;;  %1153 = vmatprep.subr.bf16.mxu0 %v1330_v8  ;;  %v1346_v24 = vld [vmem:[%s1813_s1 + $0x48] sm:$0xff]   ;;  %v1350_v28 = vld [vmem:[%s1813_s1 + $0x40] sm:$0xff]   ;;  %v1360_v36 = vld [vmem:[%s1813_s1 + $0x118] sm:$0xff]  }
   0xa   :  { %1217 = vmatprep.subr.bf16.mxu1 %v1331_v9  ;;  %v1347_v25 = vld [vmem:[%s1813_s1 + $0xc8] sm:$0xff]   ;;  %v1351_v29 = vld [vmem:[%s1813_s1 + $0xc0] sm:$0xff]   ;;  %v1373_v42 = vld [vmem:[%s1813_s1 + $0x110] sm:$0xff]  }
   0xb   :  { %v1348_v26 = vld [vmem:[%s1813_s1 + $0x8] sm:$0xff]   ;;  %v1352_v30 = vld [vmem:[%s1813_s1] sm:$0xff]   ;;  %v1369_v43 = vld [vmem:[%s1812_s0 + $0x5c] ss:$20 sps:$4 sm:$0xff]  }
   0xc   :  { %1154 = vmatpush3.bf16.msra.mxu0 %v1332_v10  ;;  %v1349_v27 = vld [vmem:[%s1813_s1 + $0x88] sm:$0xff]   ;;  %v1353_v31 = vld [vmem:[%s1813_s1 + $0x80] sm:$0xff]   ;;  %v1374_v47 = vld [vmem:[%s1812_s0 + $0x7c] ss:$20 sps:$4 sm:$0xff]  }
   0xd   :  { %1218 = vmatpush3.bf16.msra.mxu1 %v1333_v11  ;;  %1155 = vmatprep.subr.bf16.mxu0 %v1334_v12  ;;  %v1354_v32 = vld [vmem:[%s1812_s0] ss:$20 sps:$4 sm:$0xff]   ;;  %v1356_v33 = vld [vmem:[%s1812_s0 + $0x4] ss:$20 sps:$4 sm:$0xff]   ;;  %v1357_v34 = vld [vmem:[%s1812_s0 + $0x8] ss:$20 sps:$4 sm:$0xff]  }
   0xe   :  { %1219 = vmatprep.subr.bf16.mxu1 %v1335_v13  ;;  %v1359_v35 = vld [vmem:[%s1812_s0 + $0xc] ss:$20 sps:$4 sm:$0xff]   ;;  %644 = vmatprep.mubr.bf16.mxu0 %v1356_v33  ;;  %v1363_v38 = vld [vmem:[%s1812_s0 + $0x34] ss:$20 sps:$4 sm:$0xff]   ;;  %v1366_v40 = vld [vmem:[%s1812_s0 + $0x30] ss:$20 sps:$4 sm:$0xff]  }
   0xf   :  { %741 = vmatprep.mubr.bf16.mxu1 %v1359_v35  ;;  %v1361_v37 = vld [vmem:[%s1812_s0 + $0x2c] ss:$20 sps:$4 sm:$0xff]   ;;  %v1365_v39 = vld [vmem:[%s1812_s0 + $0x28] ss:$20 sps:$4 sm:$0xff]   ;;  %v1371_v44 = vld [vmem:[%s1812_s0 + $0x50] ss:$20 sps:$4 sm:$0xff]  }
  0x10   :  { %1156 = vmatpush3.bf16.msra.mxu0 %v1336_v14  ;;  %v1367_v41 = vld [vmem:[%s1812_s0 + $0x54] ss:$20 sps:$4 sm:$0xff]   ;;  %v1372_v45 = vld [vmem:[%s1812_s0 + $0x58] ss:$20 sps:$4 sm:$0xff]   ;;  %v1399_v49 = vld [vmem:[%s1813_s1 + $0x100] sm:$0xff]  }
  0x11   :  { %1220 = vmatpush3.bf16.msra.mxu1 %v1337_v15  ;;  %1157 = vmatprep.subr.bf16.mxu0 %v1338_v16  ;;  %v1386_v46 = vld [vmem:[%s1813_s1 + $0x108] sm:$0xff]   ;;  %v1376_v48 = vld [vmem:[%s1812_s0 + $0x84] ss:$20 sps:$4 sm:$0xff]   ;;  %v1379_v51 = vld [vmem:[%s1812_s0 + $0x80] ss:$20 sps:$4 sm:$0xff]  }
  0x12   :  { %1221 = vmatprep.subr.bf16.mxu1 %v1339_v17  ;;  %v1378_v50 = vld [vmem:[%s1812_s0 + $0x78] ss:$20 sps:$4 sm:$0xff]   ;;  %v1384_v54 = vld [vmem:[%s1812_s0 + $0xa0] ss:$20 sps:$4 sm:$0xff]   ;;  %v1385_v55 = vld [vmem:[%s1812_s0 + $0xa8] ss:$20 sps:$4 sm:$0xff]  }
  0x13   :  { %v1380_v52 = vld [vmem:[%s1812_s0 + $0xa4] ss:$20 sps:$4 sm:$0xff]   ;;  %v1382_v53 = vld [vmem:[%s1812_s0 + $0xac] ss:$20 sps:$4 sm:$0xff]  }
  0x14   :  { %1158 = vmatpush3.bf16.msra.mxu0 %v1340_v18  ;;  %v1387_v56 = vld [vmem:[%s1812_s0 + $0xcc] ss:$20 sps:$4 sm:$0xff]  }
  0x15   :  { %1222 = vmatpush3.bf16.msra.mxu1 %v1341_v19  ;;  %1159 = vmatprep.subr.bf16.mxu0 %v1342_v20 }
  0x16   :  { %1223 = vmatprep.subr.bf16.mxu1 %v1343_v21 }
  0x18   :  { %1160 = vmatpush3.bf16.msra.mxu0 %v1344_v22 }
  0x19   :  { %1224 = vmatpush3.bf16.msra.mxu1 %v1345_v23  ;;  %1161 = vmatprep.subr.bf16.mxu0 %v1346_v24 }
  0x1a   :  { %1225 = vmatprep.subr.bf16.mxu1 %v1347_v25 }
  0x1c   :  { %1162 = vmatpush3.bf16.msra.mxu0 %v1348_v26 }
  0x1d   :  { %1226 = vmatpush3.bf16.msra.mxu1 %v1349_v27  ;;  %1163 = vmatprep.subr.bf16.mxu0 %v1350_v28 }
  0x1e   :  { %1227 = vmatprep.subr.bf16.mxu1 %v1351_v29 }
  0x20   :  { %1164 = vmatpush3.bf16.msra.mxu0 %v1352_v30 }
  0x21   :  { %1228 = vmatpush3.bf16.msra.mxu1 %v1353_v31  ;;  %1289 = vmatprep.subr.bf16.mxu0 %v1360_v36 }
  0x22   :  { %1313 = vmatprep.subr.bf16.mxu1 %v1360_v36 }
  0x23   :  { %645 = vmatmul.mubr.bf16.vlgmr.msra.gmra.mxu0 %v1354_v32 }
  0x24   :  { %742 = vmatmul.mubr.bf16.vlgmr.msra.gmra.mxu1 %v1357_v34  ;;  %1290 = vmatpush3.bf16.msra.mxu0 %v1360_v36 }
  0x25   :  { %652 = vmatprep.mubr.bf16.mxu0 %v1361_v37  ;;  %749 = vmatprep.mubr.bf16.mxu1 %v1363_v38 }
  0x26   :  { %1317 = vmatpush3.bf16.msra.mxu1 %v1360_v36  ;;  %1291 = vmatprep.subr.bf16.mxu0 %v1373_v42 }
  0x27   :  { %1314 = vmatprep.subr.bf16.mxu1 %v1373_v42 }
  0x28   :  { %1292 = vmatpush3.bf16.msra.mxu0 %v1373_v42 }
  0x29   :  { %1293 = vmatprep.subr.bf16.mxu0 %v1386_v46 }
  0x2a   :  { %1318 = vmatpush3.bf16.msra.mxu1 %v1373_v42 }
  0x2b   :  { %653 = vmatmul.mubr.bf16.gmra.mxu0 %v1365_v39  ;;  %1315 = vmatprep.subr.bf16.mxu1 %v1386_v46 }
  0x2c   :  { %750 = vmatmul.mubr.bf16.gmra.mxu1 %v1366_v40  ;;  %660 = vmatprep.mubr.bf16.mxu0 %v1367_v41 }
  0x2d   :  { %757 = vmatprep.mubr.bf16.mxu1 %v1369_v43  ;;  %1294 = vmatpush3.bf16.msra.mxu0 %v1386_v46 }
  0x2e   :  { %1319 = vmatpush3.bf16.msra.mxu1 %v1386_v46  ;;  %1295 = vmatprep.subr.bf16.mxu0 %v1399_v49 }
  0x2f   :  { %1316 = vmatprep.subr.bf16.mxu1 %v1399_v49 }
  0x31   :  { %1296 = vmatpush3.bf16.msra.mxu0 %v1399_v49 }
  0x32   :  { %1320 = vmatpush3.bf16.msra.mxu1 %v1399_v49 }
  0x33   :  { %661 = vmatmul.mubr.bf16.gmra.mxu0 %v1371_v44 }
  0x34   :  { %758 = vmatmul.mubr.bf16.gmra.mxu1 %v1372_v45  ;;  %668 = vmatprep.mubr.bf16.mxu0 %v1374_v47 }
  0x35   :  { %765 = vmatprep.mubr.bf16.mxu1 %v1376_v48 }
  0x3b   :  { %669 = vmatmul.mubr.bf16.gmra.mxu0 %v1378_v50 }
  0x3c   :  { %766 = vmatmul.mubr.bf16.gmra.mxu1 %v1379_v51  ;;  %676 = vmatprep.mubr.bf16.mxu0 %v1380_v52 }
  0x3d   :  { %773 = vmatprep.mubr.bf16.mxu1 %v1382_v53 }
  0x3e   :  { %9 = vsyncpa [#allocation4], 0  ;;  %v1389_v57 = vld [vmem:[%s1812_s0 + $0xd4] ss:$20 sps:$4 sm:$0xff]   ;;  %v1392_v59 = vld [vmem:[%s1812_s0 + $0xd0] ss:$20 sps:$4 sm:$0xff]  }
  0x3f   :  { %v1391_v58 = vld [vmem:[%s1812_s0 + $0xc8] ss:$20 sps:$4 sm:$0xff]   ;;  %v1397_v62 = vld [vmem:[%s1812_s0 + $0xf0] ss:$20 sps:$4 sm:$0xff]   ;;  %v1398_v63 = vld [vmem:[%s1812_s0 + $0xf8] ss:$20 sps:$4 sm:$0xff]  }
  0x40   :  { %v1393_v60 = vld [vmem:[%s1812_s0 + $0xf4] ss:$20 sps:$4 sm:$0xff]   ;;  %v1395_v61 = vld [vmem:[%s1812_s0 + $0xfc] ss:$20 sps:$4 sm:$0xff]   ;;  %v1402_v1 = vld [vmem:[%s1812_s0 + $0x124] ss:$20 sps:$4 sm:$0xff]  }
  0x41   :  { %v1400_v0 = vld [vmem:[%s1812_s0 + $0x11c] ss:$20 sps:$4 sm:$0xff]   ;;  %v1404_v2 = vld [vmem:[%s1812_s0 + $0x118] ss:$20 sps:$4 sm:$0xff]   ;;  %v1405_v3 = vld [vmem:[%s1812_s0 + $0x120] ss:$20 sps:$4 sm:$0xff]  }
  0x42   :  { %v1406_v4 = vld [vmem:[%s1812_s0 + $0x10] ss:$20 sps:$4 sm:$0xff]   ;;  %vm587_vm0 = vcmask 523264   ;;  %v1408_v6 = vld [vmem:[%s1812_s0 + $0x38] ss:$20 sps:$4 sm:$0xff]   ;;  %vm1044_vm1 = vcmask 1040384  }
  0x43   :  { %677 = vmatmul.mubr.bf16.gmra.mxu0 %v1384_v54  ;;  %v1407_v5 = vld [vmem:[%s1812_s0 + $0xb0] ss:$20 sps:$4 sm:$0xff]   ;;  %v1409_v7 = vld [vmem:[%s1812_s0 + $0xd8] ss:$20 sps:$4 sm:$0xff]   ;;  %v1410_v8 = vld [vmem:[%s1812_s0 + $0x60] ss:$20 sps:$4 sm:$0xff]  }
  0x44   :  { %774 = vmatmul.mubr.bf16.gmra.mxu1 %v1385_v55  ;;  %684 = vmatprep.mubr.bf16.mxu0 %v1387_v56  ;;  %v1411_v9 = vld [vmem:[%s1812_s0 + $0x100] ss:$20 sps:$4 sm:$0xff]   ;;  %v1412_v10 = vld [vmem:[%s1812_s0 + $0x88] ss:$20 sps:$4 sm:$0xff]  }
  0x45   :  { %781 = vmatprep.mubr.bf16.mxu1 %v1389_v57  ;;  %v1413_v11 = vld [vmem:[%s1812_s0 + $0x128] ss:$20 sps:$4 sm:$0xff]  }
  0x4b   :  { %685 = vmatmul.mubr.bf16.gmra.mxu0 %v1391_v58 }
  0x4c   :  { %782 = vmatmul.mubr.bf16.gmra.mxu1 %v1392_v59  ;;  %692 = vmatprep.mubr.bf16.mxu0 %v1393_v60 }
  0x4d   :  { %789 = vmatprep.mubr.bf16.mxu1 %v1395_v61 }
  0x53   :  { %693 = vmatmul.mubr.bf16.gmra.mxu0 %v1397_v62 }
  0x54   :  { %790 = vmatmul.mubr.bf16.gmra.mxu1 %v1398_v63  ;;  %700 = vmatprep.mubr.bf16.mxu0 %v1400_v0 }
  0x55   :  { %797 = vmatprep.mubr.bf16.mxu1 %v1402_v1 }
  0x5b   :  { %701 = vmatmul.mubr.bf16.gmra.mxu0 %v1404_v2 }
  0x5c   :  { %798 = vmatmul.mubr.bf16.gmra.mxu1 %v1405_v3  ;;  %1297 = vmatprep.mubr.msk.bf16.mxu0 %vm587_vm0, %v1406_v4 }
  0x5d   :  { %1305 = vmatprep.mubr.msk.bf16.mxu1 %vm587_vm0, %v1407_v5 }
  0x63   :  { %1298 = vmatmul.mubr.msk.bf16.vlgmr.msra.gmra.mxu0 %vm587_vm0, %v1408_v6 }
  0x64   :  { %1306 = vmatmul.mubr.msk.bf16.vlgmr.msra.gmra.mxu1 %vm587_vm0, %v1409_v7  ;;  %1301 = vmatprep.mubr.msk.bf16.mxu0 %vm587_vm0, %v1410_v8 }
  0x65   :  { %1309 = vmatprep.mubr.msk.bf16.mxu1 %vm587_vm0, %v1411_v9 }
  0x6b   :  { %1302 = vmatmul.mubr.msk.bf16.gmra.mxu0 %vm587_vm0, %v1412_v10 }
  0x6c   :  { %1310 = vmatmul.mubr.msk.bf16.gmra.mxu1 %vm587_vm0, %v1413_v11 }
  0xe3   :  { %v1165_v12 = vpop.f32.mrf.mxu0 }
  0xe4   :  { %v1229_v13 = vpop.f32.mrf.mxu1 }
  0xe5   :  { %v1166_v14 = vpop.f32.mrf.mxu0 }
  0xe6   :  { %v1230_v15 = vpop.f32.mrf.mxu1  ;;  %v1167_v6 = vadd.f32 %v1166_v14, %v1165_v12 }
  0xe7   :  { %v1168_v16 = vpop.f32.mrf.mxu0  ;;  %v1231_v7 = vadd.f32 %v1230_v15, %v1229_v13 }
  0xe8   :  { %v1232_v17 = vpop.f32.mrf.mxu1 }
  0xe9   :  { %v1169_v18 = vpop.f32.mrf.mxu0 }
  0xea   :  { %v1233_v19 = vpop.f32.mrf.mxu1  ;;  %v1170_v9 = vadd.f32 %v1169_v18, %v1168_v16  ;;  %v744_v16 = vadd.f32 %v1231_v7, %v1167_v6 }
  0xeb   :  { %v1171_v20 = vpop.f32.mrf.mxu0  ;;  %v1234_v10 = vadd.f32 %v1233_v19, %v1232_v17 }
  0xec   :  { %v1235_v21 = vpop.f32.mrf.mxu1 }
  0xed   :  { %v1172_v22 = vpop.f32.mrf.mxu0  ;;  %v747_v18 = vadd.f32 %v1234_v10, %v1170_v9 }
  0xee   :  { %v1236_v23 = vpop.f32.mrf.mxu1  ;;  %v1173_v11 = vadd.f32 %v1172_v22, %v1171_v20 }
  0xef   :  { %v1174_v24 = vpop.f32.mrf.mxu0 }
  0xf0   :  { %v1238_v25 = vpop.f32.mrf.mxu1 }
  0xf1   :  { %v1175_v26 = vpop.f32.mrf.mxu0 }
  0xf2   :  { %v1239_v27 = vpop.f32.mrf.mxu1 }
  0xf3   :  { %v1177_v28 = vpop.f32.mrf.mxu0 }
  0xf4   :  { %v1241_v29 = vpop.f32.mrf.mxu1 }
  0xf5   :  { %v1178_v30 = vpop.f32.mrf.mxu0 }
  0xf6   :  { %v1242_v31 = vpop.f32.mrf.mxu1 }
  0xf7   :  { %v1725_v32 = vpop.f32.mrf.mxu0 }
  0xf8   :  { %1816 = vst [vmem:[#allocation6_spill] sm:$0xff] %v1725_v32  ;;  %v1727_v33 = vpop.f32.mrf.mxu1 }
  0xf9   :  { %1817 = vst [vmem:[#allocation7_spill] sm:$0xff] %v1727_v33  ;;  %v1729_v34 = vpop.f32.mrf.mxu0 }
  0xfa   :  { %1818 = vst [vmem:[#allocation8_spill] sm:$0xff] %v1729_v34  ;;  %v1731_v35 = vpop.f32.mrf.mxu1  ;;  %v1243_v34 = vadd.f32 %v1242_v31, %v1241_v29 }
  0xfb   :  { %1819 = vst [vmem:[#allocation9_spill] sm:$0xff] %v1731_v35  ;;  %v1183_v36 = vpop.f32.mrf.mxu0  ;;  %v1237_v35 = vadd.f32 %v1236_v23, %v1235_v21 }
  0xfc   :  { %v1247_v37 = vpop.f32.mrf.mxu1 }
  0xfd   :  { %v1184_v38 = vpop.f32.mrf.mxu0  ;;  %v752_v15 = vadd.f32 %v1237_v35, %v1173_v11 }
  0xfe   :  { %v1248_v39 = vpop.f32.mrf.mxu1  ;;  %v1185_v14 = vadd.f32 %v1184_v38, %v1183_v36 }
  0xff   :  { %v1733_v40 = vpop.f32.mrf.mxu0  ;;  %v1249_v17 = vadd.f32 %v1248_v39, %v1247_v37  ;;  %v1828_v23 = vld [vmem:[#allocation6_spill] sm:$0xff] }
 0x100   :  { %1820 = vst [vmem:[#allocation10_spill] sm:$0xff] %v1733_v40  ;;  %v1735_v41 = vpop.f32.mrf.mxu1  ;;  %v1240_v40 = vadd.f32 %v1239_v27, %v1238_v25 }
 0x101   :  { %1821 = vst [vmem:[#allocation11_spill] sm:$0xff] %v1735_v41  ;;  %v1737_v42 = vpop.f32.mrf.mxu0 }
 0x102   :  { %1822 = vst [vmem:[#allocation12_spill] sm:$0xff] %v1737_v42  ;;  %v1739_v43 = vpop.f32.mrf.mxu1 }
 0x103   :  { %1823 = vst [vmem:[#allocation13_spill] sm:$0xff] %v1739_v43  ;;  %v1189_v44 = vpop.f32.mrf.mxu0 }
 0x104   :  { %v1253_v45 = vpop.f32.mrf.mxu1 }
 0x105   :  { %v1190_v46 = vpop.f32.mrf.mxu0 }
 0x106   :  { %v1254_v47 = vpop.f32.mrf.mxu1  ;;  %v1191_v32 = vadd.f32 %v1190_v46, %v1189_v44  ;;  %v768_v46 = vadd.f32 %v1249_v17, %v1185_v14 }
 0x107   :  { %v1192_v48 = vpop.f32.mrf.mxu0 }
 0x108   :  { %v1256_v49 = vpop.f32.mrf.mxu1 }
 0x109   :  { %v1193_v50 = vpop.f32.mrf.mxu0 }
 0x10a   :  { %v1257_v51 = vpop.f32.mrf.mxu1  ;;  %v1194_v29 = vadd.f32 %v1193_v50, %v1192_v48  ;;  %v1830_v48 = vld [vmem:[#allocation10_spill] sm:$0xff] }
 0x10b   :  { %v1195_v52 = vpop.f32.mrf.mxu0 }
 0x10c   :  { %v1259_v53 = vpop.f32.mrf.mxu1 }
 0x10d   :  { %v1196_v54 = vpop.f32.mrf.mxu0 }
 0x10e   :  { %v1260_v55 = vpop.f32.mrf.mxu1  ;;  %v1197_v43 = vadd.f32 %v1196_v54, %v1195_v52  ;;  %v1829_v52 = vld [vmem:[#allocation8_spill] sm:$0xff]  ;;  %v1832_v54 = vld [vmem:[#allocation11_spill] sm:$0xff] }
 0x10f   :  { %v1198_v56 = vpop.f32.mrf.mxu0  ;;  %v1261_v41 = vadd.f32 %v1260_v55, %v1259_v53  ;;  %v1833_v55 = vld [vmem:[#allocation13_spill] sm:$0xff] }
 0x110   :  { %v1262_v57 = vpop.f32.mrf.mxu1 }
 0x111   :  { %v1199_v58 = vpop.f32.mrf.mxu0  ;;  %v784_v22 = vadd.f32 %v1261_v41, %v1197_v43 }
 0x112   :  { %v1263_v59 = vpop.f32.mrf.mxu1  ;;  %v1200_v19 = vadd.f32 %v1199_v58, %v1198_v56  ;;  %v1252_v56 = vadd.f32 %v1833_v55, %v1832_v54 }
 0x113   :  { %v1201_v60 = vpop.f32.mrf.mxu0  ;;  %v1264_v20 = vadd.f32 %v1263_v59, %v1262_v57 }
 0x114   :  { %v1265_v61 = vpop.f32.mrf.mxu1 }
 0x115   :  { %v1202_v62 = vpop.f32.mrf.mxu0  ;;  %v787_v43 = vadd.f32 %v1264_v20, %v1200_v19 }
 0x116   :  { %v1266_v63 = vpop.f32.mrf.mxu1 }
 0x117   :  { %v1741_v0 = vpop.f32.mrf.mxu0  ;;  %v1267_v53 = vadd.f32 %v1266_v63, %v1265_v61  ;;  %v1834_v63 = vld [vmem:[#allocation7_spill] sm:$0xff] }
 0x118   :  { %1824 = vst [vmem:[#allocation14_spill] sm:$0xff] %v1741_v0  ;;  %v1743_v1 = vpop.f32.mrf.mxu1  ;;  %v1176_v0 = vadd.f32 %v1175_v26, %v1174_v24  ;;  %v1182_v24 = vadd.f32 %v1829_v52, %v1828_v23 }
 0x119   :  { %1825 = vst [vmem:[#allocation15_spill] sm:$0xff] %v1743_v1  ;;  %v1745_v2 = vpop.f32.mrf.mxu0  ;;  %v1179_v1 = vadd.f32 %v1178_v30, %v1177_v28  ;;  %v1258_v30 = vadd.f32 %v1257_v51, %v1256_v49  ;;  %v1831_v49 = vld [vmem:[#allocation12_spill] sm:$0xff] }
 0x11a   :  { %1826 = vst [vmem:[#allocation16_spill] sm:$0xff] %v1745_v2  ;;  %v1747_v3 = vpop.f32.mrf.mxu1  ;;  %v755_v27 = vadd.f32 %v1240_v40, %v1176_v0  ;;  %v1188_v50 = vadd.f32 %v1831_v49, %v1830_v48 }
 0x11b   :  { %1827 = vst [vmem:[#allocation17_spill] sm:$0xff] %v1747_v3  ;;  %v1207_v4 = vpop.f32.mrf.mxu0  ;;  %v1255_v3 = vadd.f32 %v1254_v47, %v1253_v45  ;;  %v760_v28 = vadd.f32 %v1243_v34, %v1179_v1  ;;  %v1203_v47 = vadd.f32 %v1202_v62, %v1201_v60  ;;  %v1835_v1 = vld [vmem:[#allocation9_spill] sm:$0xff] }
 0x11c   :  { %v1271_v5 = vpop.f32.mrf.mxu1 }
 0x11d   :  { %v1208_v8 = vpop.f32.mrf.mxu0  ;;  %v776_v38 = vadd.f32 %v1255_v3, %v1191_v32  ;;  %v1246_v3 = vadd.f32 %v1835_v1, %v1834_v63  ;;  %v792_v6 = vadd.f32 %v1267_v53, %v1203_v47 }
 0x11e   :  { %v1272_v33 = vpop.f32.mrf.mxu1  ;;  %v1209_v35 = vadd.f32 %v1208_v8, %v1207_v4 }
 0x11f   :  { %v1210_v42 = vpop.f32.mrf.mxu0  ;;  %v1273_v44 = vadd.f32 %v1272_v33, %v1271_v5  ;;  %v779_v33 = vadd.f32 %v1258_v30, %v1194_v29  ;;  %v1836_v7 = vld [vmem:[#allocation14_spill] sm:$0xff] }
 0x120   :  { %v1274_v2 = vpop.f32.mrf.mxu1  ;;  %v1838_v10 = vld [vmem:[#allocation15_spill] sm:$0xff] }
 0x121   :  { %v1211_v12 = vpop.f32.mrf.mxu0  ;;  %v800_v59 = vadd.f32 %v1273_v44, %v1209_v35  ;;  %v1837_v8 = vld [vmem:[#allocation16_spill] sm:$0xff] }
 0x122   :  { %v1275_v13 = vpop.f32.mrf.mxu1  ;;  %v1212_v0 = vadd.f32 %v1211_v12, %v1210_v42  ;;  %v1206_v9 = vadd.f32 %v1837_v8, %v1836_v7  ;;  %v1839_v11 = vld [vmem:[#allocation17_spill] sm:$0xff] }
 0x123   :  { %v1299_v21 = vpop.f32.mrf.mxu0  ;;  %v1276_v60 = vadd.f32 %v1275_v13, %v1274_v2  ;;  %v1270_v14 = vadd.f32 %v1839_v11, %v1838_v10  ;;  %v771_v13 = vadd.f32 %v1252_v56, %v1188_v50 }
 0x124   :  { %v849_v25 = vadd.f32 %v1299_v21, %v752_v15  ;;  %v1307_v26 = vpop.f32.mrf.mxu1  ;;  %v763_v21 = vadd.f32 %v1246_v3, %v1182_v24 }
 0x125   :  { %v881_v31 = vadd.f32 %v1307_v26, %v784_v22  ;;  %v840_v36 = vpop.f32.mrf.mxu0  ;;  %v803_v17 = vadd.f32 %v1276_v60, %v1212_v0  ;;  %v795_v52 = vadd.f32 %v1270_v14, %v1206_v9 }
 0x126   :  { %1414 = vtanh.f32 %v849_v25  ;;  %v841_v37 = vadd.f32 %v840_v36, %v744_v16  ;;  %v872_v39 = vpop.f32.mrf.mxu1 }
 0x127   :  { %1416 = vtanh.f32 %v881_v31  ;;  %v873_v45 = vadd.f32 %v872_v39, %v776_v38  ;;  %v1300_v41 = vpop.f32.mrf.mxu0 }
 0x128   :  { %1418 = vtanh.f32 %v841_v37  ;;  %v852_v40 = vadd.f32 %v1300_v41, %v755_v27  ;;  %v1308_v34 = vpop.f32.mrf.mxu1 }
 0x129   :  { %1420 = vtanh.f32 %v873_v45  ;;  %v884_v32 = vadd.f32 %v1308_v34, %v787_v43  ;;  %v843_v51 = vpop.f32.mrf.mxu0 }
 0x12a   :  { %1422 = vtanh.f32 %v852_v40  ;;  %v844_v57 = vadd.f32 %v843_v51, %v747_v18  ;;  %v875_v58 = vpop.f32.mrf.mxu1 }
 0x12b   :  { %1424 = vtanh.f32 %v884_v32  ;;  %v876_v61 = vadd.f32 %v875_v58, %v779_v33  ;;  %v1303_v62 = vpop.f32.mrf.mxu0 }
 0x12c   :  { %1426 = vtanh.f32 %v844_v57  ;;  %v865_v4 = vadd.f32 %v1303_v62, %v768_v46  ;;  %v1311_v5 = vpop.f32.mrf.mxu1 }
 0x12d   :  { %1428 = vtanh.f32 %v876_v61  ;;  %v897_v15 = vadd.f32 %v1311_v5, %v800_v59  ;;  %v856_v42 = vpop.f32.mrf.mxu0 }
 0x12e   :  { %1430 = vtanh.f32 %v865_v4  ;;  %v857_v2 = vadd.f32 %v856_v42, %v760_v28  ;;  %v888_v12 = vpop.f32.mrf.mxu1 }
 0x12f   :  { %1432 = vtanh.f32 %v897_v15  ;;  %v889_v16 = vadd.f32 %v888_v12, %v792_v6  ;;  %v1304_v18 = vpop.f32.mrf.mxu0 }
 0x130   :  { %1434 = vtanh.f32 %v857_v2  ;;  %v868_v19 = vadd.f32 %v1304_v18, %v771_v13  ;;  %v1312_v20 = vpop.f32.mrf.mxu1 }
 0x131   :  { %1436 = vtanh.f32 %v889_v16  ;;  %v900_v22 = vadd.f32 %v1312_v20, %v803_v17  ;;  %v859_v23 = vpop.f32.mrf.mxu0 }
 0x132   :  { %1438 = vtanh.f32 %v868_v19  ;;  %v860_v25 = vadd.f32 %v859_v23, %v763_v21  ;;  %v891_v26 = vpop.f32.mrf.mxu1 }
 0x133   :  { %v1415_v27 = vpop.eup %1414  ;;  %1440 = vtanh.f32 %v900_v22  ;;  %v892_v28 = vadd.f32 %v891_v26, %v795_v52 }
 0x134   :  { %v1417_v29 = vpop.eup %1416  ;;  %972 = vst [vmem:[%s1814_s2 + $0x10] sm:$0xff] %v1415_v27  ;;  %1442 = vtanh.f32 %v860_v25  ;;  %v1009_v43 = vmul.f32 %v1415_v27, %v1415_v27 }
 0x135   :  { %v1419_v30 = vpop.eup %1418  ;;  %980 = vst [vmem:[%s1814_s2 + $0x50] sm:$0xff] %v1417_v29  ;;  %1444 = vtanh.f32 %v892_v28  ;;  %v1017_v10 = vmul.f32 %v1417_v29, %v1417_v29 }
 0x136   :  { %v1421_v24 = vpop.eup %1420  ;;  %970 = vst [vmem:[%s1814_s2] sm:$0xff] %v1419_v30  ;;  %v1007_v44 = vmul.f32 %v1419_v30, %v1419_v30 }
 0x137   :  { %v1423_v31 = vpop.eup %1422  ;;  %978 = vst [vmem:[%s1814_s2 + $0x40] sm:$0xff] %v1421_v24  ;;  %v1015_v4 = vmul.f32 %v1421_v24, %v1421_v24 }
 0x138   :  { %v1425_v36 = vpop.eup %1424  ;;  %973 = vst [vmem:[%s1814_s2 + $0x18] sm:$0xff] %v1423_v31  ;;  %v1010_v34 = vmul.f32 %v1423_v31, %v1423_v31 }
 0x139   :  { %v1427_v38 = vpop.eup %1426  ;;  %981 = vst [vmem:[%s1814_s2 + $0x58] sm:$0xff] %v1425_v36  ;;  %v1018_v15 = vmul.f32 %v1425_v36, %v1425_v36 }
 0x13a   :  { %v1429_v35 = vpop.eup %1428  ;;  %971 = vst [vmem:[%s1814_s2 + $0x8] sm:$0xff] %v1427_v38  ;;  %v986_v37 = vadd.f32 %v1427_v38, %v1419_v30  ;;  %v1008_v39 = vmul.f32 %v1427_v38, %v1427_v38 }
 0x13b   :  { %v1431_v45 = vpop.eup %1430  ;;  %979 = vst [vmem:[%s1814_s2 + $0x48] sm:$0xff] %v1429_v35  ;;  %v1016_v7 = vmul.f32 %v1429_v35, %v1429_v35 }
 0x13c   :  { %v1433_v41 = vpop.eup %1432  ;;  %v987_v46 = vadd.f32 %v1415_v27, %v986_v37  ;;  %v1023_v47 = vadd.f32 %v1008_v39, %v1007_v44  ;;  %976 = vst [vmem:[%s1814_s2 + $0x30] sm:$0xff] %v1431_v45  ;;  %v1013_v60 = vmul.f32 %v1431_v45, %v1431_v45 }
 0x13d   :  { %v1435_v53 = vpop.eup %1434  ;;  %984 = vst [vmem:[%s1814_s2 + $0x70] sm:$0xff] %v1433_v41  ;;  %v1021_v20 = vmul.f32 %v1433_v41, %v1433_v41 }
 0x13e   :  { %v1437_v40 = vpop.eup %1436  ;;  %v1024_v48 = vadd.f32 %v1023_v47, %v1009_v43  ;;  %974 = vst [vmem:[%s1814_s2 + $0x20] sm:$0xff] %v1435_v53  ;;  %v988_v49 = vadd.f32 %v1423_v31, %v987_v46  ;;  %v1011_v33 = vmul.f32 %v1435_v53, %v1435_v53 }
 0x13f   :  { %v1439_v50 = vpop.eup %1438  ;;  %982 = vst [vmem:[%s1814_s2 + $0x60] sm:$0xff] %v1437_v40  ;;  %v1019_v12 = vmul.f32 %v1437_v40, %v1437_v40 }
 0x140   :  { %v1441_v32 = vpop.eup %1440  ;;  %v989_v51 = vadd.f32 %v1435_v53, %v988_v49  ;;  %977 = vst [vmem:[%s1814_s2 + $0x38] sm:$0xff] %v1439_v50  ;;  %v1025_v54 = vadd.f32 %v1024_v48, %v1010_v34  ;;  %v1014_v63 = vmul.f32 %v1439_v50, %v1439_v50 }
 0x141   :  { %v1443_v55 = vpop.eup %1442  ;;  %985 = vst [vmem:[%s1814_s2 + $0x78] sm:$0xff] %v1441_v32  ;;  %v1022_v23 = vmul.f32 %v1441_v32, %v1441_v32 }
 0x142   :  { %v1445_v56 = vpop.eup %1444  ;;  %975 = vst [vmem:[%s1814_s2 + $0x28] sm:$0xff] %v1443_v55  ;;  %v1012_v57 = vmul.f32 %v1443_v55, %v1443_v55  ;;  %v990_v58 = vadd.f32 %v1443_v55, %v989_v51  ;;  %v1026_v59 = vadd.f32 %v1025_v54, %v1011_v33 }
 0x143   :  { %983 = vst [vmem:[%s1814_s2 + $0x68] sm:$0xff] %v1445_v56  ;;  %v1020_v18 = vmul.f32 %v1445_v56, %v1445_v56  ;;  %s1468_s2 = smov [#allocation3]  }
 0x144   :  { %v991_v0 = vadd.f32 %v1431_v45, %v990_v58  ;;  %v1027_v61 = vadd.f32 %v1026_v59, %v1012_v57  ;;  %s1055_s29 = sshll.u32 %s1468_s2, 4  ;;  %s1056_s29 = int_to_ptr.vmem [resolvable:$true] %s1055_s29 }
 0x145   :  { %s1446_s30 = scalar_lea.vmem %s1056_s29, 32  ;;  %p1451_p1 = scmp.lt.s32.totalorder %s1056_s29, %s1056_s29 }
 0x146   :  { %v992_v62 = vadd.f32 %v1439_v50, %v991_v0  ;;  %v1028_v1 = vadd.f32 %v1027_v61, %v1013_v60  ;;  %p1447_p0 = scmp.ne.s32.totalorder %s1056_s29, %s1446_s30  ;;  %p1452_p2 = scmp.lt.s32.totalorder %s1446_s30, %s1446_s30 }
 0x148   :  { %v993_v3 = vadd.f32 %v1421_v24, %v992_v62  ;;  %v1029_v5 = vadd.f32 %v1028_v1, %v1014_v63  ;;  %p1453_p3 = por %p1452_p2, %p1451_p1 }
 0x14a   :  { %v994_v6 = vadd.f32 %v1429_v35, %v993_v3  ;;  %v1030_v8 = vadd.f32 %v1029_v5, %v1015_v4  ;;  %p1454_p4 = pnand %p1453_p3, %p1447_p0 }
 0x14c   :  { %v995_v9 = vadd.f32 %v1417_v29, %v994_v6  ;;  %v1031_v11 = vadd.f32 %v1030_v8, %v1016_v7 }
 0x14e   :  { %v996_v14 = vadd.f32 %v1425_v36, %v995_v9  ;;  %v1032_v42 = vadd.f32 %v1031_v11, %v1017_v10 }
 0x150   :  { %v997_v2 = vadd.f32 %v1437_v40, %v996_v14  ;;  %v1033_v13 = vadd.f32 %v1032_v42, %v1018_v15 }
 0x152   :  { %v998_v16 = vadd.f32 %v1445_v56, %v997_v2  ;;  %v1034_v17 = vadd.f32 %v1033_v13, %v1019_v12 }
 0x154   :  { %v999_v19 = vadd.f32 %v1433_v41, %v998_v16  ;;  %v1035_v21 = vadd.f32 %v1034_v17, %v1020_v18 }
 0x156   :  { %v1000_v22 = vadd.f32 %v1441_v32, %v999_v19  ;;  %v1036_v52 = vadd.f32 %v1035_v21, %v1021_v20 }
 0x158   :  { %v1001_v25 = vrot.slane %v1000_v22, 4  ;;  %v1037_v26 = vadd.f32 %v1036_v52, %v1022_v23 }
 0x15a   :  { %v1002_v27 = vadd.f32 %v1001_v25, %v1000_v22  ;;  %v1038_v28 = vrot.slane %v1037_v26, 4 }
 0x15c   :  { %v1003_v29 = vrot.slane %v1002_v27, 2  ;;  %v1039_v30 = vadd.f32 %v1038_v28, %v1037_v26 }
 0x15e   :  { %v1004_v24 = vadd.f32 %v1003_v29, %v1002_v27  ;;  %v1040_v31 = vrot.slane %v1039_v30, 2 }
 0x160   :  { %v1005_v36 = vrot.slane %v1004_v24, 1  ;;  %v1041_v38 = vadd.f32 %v1040_v31, %v1039_v30 }
 0x162   :  { %v1042_v35 = vrot.slane %v1041_v38, 1  ;;  %v1006_v44 = vadd.f32 %v1005_v36, %v1004_v24 }
 0x164   :  { %v1043_v37 = vadd.f32 %v1042_v35, %v1041_v38 }
 0x166   :  { %v1045_v39 = vsel %vm1044_vm1, %v1006_v44, %v1043_v37 }
 0x167   :  { %1046 = vst [vmem:[#allocation3] sm:$0x3] %v1045_v39 }
 0x168   :  { %1457 = shalt.err (!%p1454_p4)
}
 0x169   :  { %1058 = dma.vmem_to_hbm [thread:$0]  %s1056_s29, 32, %s1815_s3, [#allocation4]  }
 0x16a   :  { %1466 = dma.done.wait [#allocation4], 32  }
 0x16b   :  { %1467 = vsyncadd [#allocation4], 4294967264 }
 0x16c   :  { %1064 = vsyncpa [#allocation4], 1 }

</bundles_post_ra>
